<compile_context>
chip_gen: v7x
topology: tpu7x:2x2x1
jax: 0.10.0
libtpu: 0.0.40
codegen_flags: <defaults>
</compile_context>

<pallas_src>
import functools
import itertools
import numpy as np
import jax
import jax.numpy as jnp
from jax import lax
from jax.experimental import pallas as pl
from jax.experimental.pallas import tpu as pltpu

try:
    from scipy.optimize import linear_sum_assignment as _scipy_lsa
except Exception:                                   # pragma: no cover
    _scipy_lsa = None

_NEG_BIG = -1e30  # "log zero" sentinel (finite, avoids inf-inf NaNs)


# --------------------------------------------------------------------------
# small helpers
# --------------------------------------------------------------------------
def _round_up(x, m):
    return ((x + m - 1) // m) * m


def _next_pow2(x):
    n = 1
    while n < x:
        n *= 2
    return n


def _tc_count():
    # TODO(synk): no public "TensorCores per chip" query; device_kind heuristic
    # (v7x has 2 TCs, v5e/v6e have 1).  Safe default: 1.
    try:
        kind = jax.devices()[0].device_kind.lower()
        if "v7" in kind:
            return 2
    except Exception:
        pass
    return 1


def _pick_row_tile(m8, pref, min_steps):
    """Largest multiple-of-8 tile <= pref that divides m8 and (if possible)
    yields >= min_steps grid steps: keeps both v7x TCs busy without adding
    per-step overhead on single-TC chips."""
    pref = max(8, min(pref, m8))
    t = (pref // 8) * 8
    largest_div = 8
    first = True
    while t >= 8:
        if m8 % t == 0:
            if first:
                largest_div = t
                first = False
            if m8 // t >= min_steps:
                return t
        t -= 8
    return largest_div


def _pick_col_tile(tp, pref=512):
    """Largest multiple-of-128 tile <= pref dividing tp (tp % 128 == 0)."""
    if tp <= pref:
        return tp
    t = (pref // 128) * 128
    while t >= 128:
        if tp % t == 0:
            return t
        t -= 128
    return 128


# --------------------------------------------------------------------------
# Pallas kernel 1: row-wise log_softmax over the (unpadded) vocab axis
# --------------------------------------------------------------------------
def _log_softmax_kernel(x_ref, o_ref):
    x = x_ref[...].astype(jnp.float32)
    m = jnp.max(x, axis=-1, keepdims=True)
    s = x - m
    lse = jnp.log(jnp.sum(jnp.exp(s), axis=-1, keepdims=True))
    o_ref[...] = s - lse


def log_softmax_pallas(x2d, tile_pref=512):
    """x2d: (M, V) -> (M, V) f32 row-wise log_softmax.  No vocab padding:
    the block last dim equals the full V, and the CTC consumes the result
    via a one-hot matmul, so no lane pad is ever materialized in HBM."""
    M, V = x2d.shape
    M8 = _round_up(max(M, 1), 8)
    tm = _pick_row_tile(M8, tile_pref, _tc_count())
    x = x2d.astype(jnp.float32)
    if M8 != M:
        x = jnp.pad(x, ((0, M8 - M), (0, 0)))
    out = pl.pallas_call(
        _log_softmax_kernel,
        out_shape=jax.ShapeDtypeStruct((M8, V), jnp.float32),
        grid=(M8 // tm,),
        in_specs=[pl.BlockSpec((tm, V), lambda i: (i, 0))],
        out_specs=pl.BlockSpec((tm, V), lambda i: (i, 0)),
        compiler_params=pltpu.CompilerParams(
            dimension_semantics=("parallel",)),
    )(x)
    return out[:M] if M8 != M else out


# --------------------------------------------------------------------------
# Pallas kernel 2: focal classification cost + pairwise L1 (block-diagonal)
# --------------------------------------------------------------------------
def _pow(x, g):
    if float(g) == 2.0:
        return x * x
    return x ** g


def _cost_kernel(packed_ref, tgtT_ref, c_ref, *, n_cls_pts,
                 class_weight, coord_weight, alpha, gamma):
    v = packed_ref[...].astype(jnp.float32)               # (tn, P + D)
    x = v[:, :n_cls_pts]                                  # (tn, P) class-0 logits

    # focal cost: a single EUP exp, sigmoid / softplus derived from it
    e = jnp.exp(-jnp.abs(x))
    lg = jnp.log(1.0 + e)                                 # softplus(-|x|)
    sp_x = jnp.maximum(x, 0.0) + lg                       # softplus(x)  = -log(1-p)
    sp_nx = jnp.maximum(-x, 0.0) + lg                     # softplus(-x) = -log(p)
    prob = jnp.where(x >= 0.0, 1.0, e) / (1.0 + e)        # sigmoid(x)
    neg = (1.0 - alpha) * _pow(prob, gamma) * sp_x
    pos = alpha * _pow(1.0 - prob, gamma) * sp_nx
    cost_class = jnp.mean(pos - neg, axis=-1, keepdims=True)    # (tn, 1)

    # pairwise L1 accumulated per coordinate into the lane-dense (tn, tT) tile
    bT = tgtT_ref[...].astype(jnp.float32)                # (D, tT)
    acc = jnp.zeros((v.shape[0], bT.shape[1]), jnp.float32)
    for d in range(bT.shape[0]):                          # D small, unrolled
        acc = acc + jnp.abs(v[:, n_cls_pts + d:n_cls_pts + d + 1] - bT[d:d + 1, :])
    c_ref[...] = class_weight * cost_class + coord_weight * acc


def cost_matrix_pallas(logits0, out_pts, tgt_pts, class_weight, coord_weight,
                       alpha, gamma, q_tile_pref=512, t_tile_pref=512):
    """Block-diagonal focal + pairwise-L1 cost.
    logits0 (bs, Nq, P), out_pts (bs, Nq, D), tgt_pts (bs, T_max, D)
    -> cost (bs, Nqp, Tp) f32 (row/col padded; caller slices on host)."""
    bs, Nq, P = logits0.shape
    D = out_pts.shape[-1]
    T_max = tgt_pts.shape[1]
    Tp = max(128, _round_up(T_max, 128))
    tT = _pick_col_tile(Tp, t_tile_pref)
    n_cores = _tc_count()
    Nq8 = _round_up(Nq, 8)
    q_min_steps = 1 if bs * (Tp // tT) >= n_cores else n_cores
    tn = _pick_row_tile(Nq8, q_tile_pref, q_min_steps)
    Nqp = Nq8

    packed = jnp.concatenate(
        [logits0.astype(jnp.float32), out_pts.astype(jnp.float32)], axis=-1)
    if Nqp != Nq:
        packed = jnp.pad(packed, ((0, 0), (0, Nqp - Nq), (0, 0)))
    tgtT = jnp.transpose(tgt_pts.astype(jnp.float32), (0, 2, 1))   # (bs, D, T_max)
    if Tp != T_max:
        tgtT = jnp.pad(tgtT, ((0, 0), (0, 0), (0, Tp - T_max)))

    kern = functools.partial(_cost_kernel, n_cls_pts=P,
                             class_weight=float(class_weight),
                             coord_weight=float(coord_weight),
                             alpha=float(alpha), gamma=float(gamma))
    return pl.pallas_call(
        kern,
        out_shape=jax.ShapeDtypeStruct((bs, Nqp, Tp), jnp.float32),
        grid=(bs, Nqp // tn, Tp // tT),
        in_specs=[pl.BlockSpec((None, tn, P + D), lambda b, i, t: (b, i, 0)),
                  pl.BlockSpec((None, D, tT), lambda b, i, t: (b, 0, t))],
        out_specs=pl.BlockSpec((None, tn, tT), lambda b, i, t: (b, i, t)),
        compiler_params=pltpu.CompilerParams(
            dimension_semantics=("parallel", "parallel", "parallel")),
    )(packed, tgtT)


# --------------------------------------------------------------------------
# CTC forward (log-space alpha recursion), queries on the lane axis.
# TODO(synk): dynamic-length DP has no clean Pallas mapping; plain JAX scan.
# --------------------------------------------------------------------------
def _ctc_nll_batched(log_probs_q, texts, lengths, blank):
    """log_probs_q (Q, T_in, C) log-softmax; texts (n_t, L_max) padded with
    `blank`; lengths (n_t,).  Returns nll (n_t, Q) f32 (not length-normalized).
    Carry is (n_t, S, Q): Q lane-dense, S shifts on the sublane axis."""
    Q, T_in, C = log_probs_q.shape
    n_t, L_max = texts.shape
    S = 2 * L_max + 1
    NEG = jnp.float32(_NEG_BIG)

    texts = texts.astype(jnp.int32)
    ext = jnp.full((n_t, S), blank, jnp.int32).at[:, 1::2].set(texts)
    ext_m2 = jnp.concatenate(
        [jnp.full((n_t, 2), blank, jnp.int32), ext[:, :-2]], axis=1)
    skip_ok = ((ext != blank) & (ext != ext_m2))[:, :, None]        # (n_t, S, 1)

    # gather-as-matmul (MXU): lp_ext[t, n, s, q] = log_probs_q[q, t, ext[n, s]]
    oh = jax.nn.one_hot(ext, C, dtype=jnp.float32)                  # (n_t, S, C)
    lp_ext = jnp.einsum('qtc,nsc->tnsq', log_probs_q.astype(jnp.float32), oh,
                        precision=lax.Precision.HIGHEST)            # (T, n_t, S, Q)

    alpha0 = jnp.full((n_t, S, Q), NEG)
    alpha0 = alpha0.at[:, 0, :].set(lp_ext[0, :, 0, :])
    alpha0 = alpha0.at[:, 1, :].set(lp_ext[0, :, 1, :])

    pad1 = jnp.full((n_t, 1, Q), NEG)
    pad2 = jnp.full((n_t, 2, Q), NEG)

    def step(alpha, lp_t):
        a1 = jnp.concatenate([pad1, alpha[:, :-1, :]], axis=1)
        a2 = jnp.concatenate([pad2, alpha[:, :-2, :]], axis=1)
        a2 = jnp.where(skip_ok, a2, NEG)
        return jnp.logaddexp(jnp.logaddexp(alpha, a1), a2) + lp_t, None

    alpha_T, _ = lax.scan(step, alpha0, lp_ext[1:])

    S_i = 2 * lengths.astype(jnp.int32) + 1                         # (n_t,)
    il = jnp.broadcast_to((S_i - 1)[:, None, None], (n_t, 1, Q))
    ip = jnp.broadcast_to(jnp.maximum(S_i - 2, 0)[:, None, None], (n_t, 1, Q))
    a_last = jnp.take_along_axis(alpha_T, il, axis=1)[:, 0, :]
    a_prev = jnp.take_along_axis(alpha_T, ip, axis=1)[:, 0, :]
    a_prev = jnp.where((S_i > 1)[:, None], a_prev, NEG)
    return -jnp.logaddexp(a_last, a_prev)                           # (n_t, Q)


# --------------------------------------------------------------------------
# one jitted device function: log_softmax -> block-diagonal cost -> CTC
# --------------------------------------------------------------------------
@functools.partial(jax.jit, static_argnames=(
    'class_weight', 'coord_weight', 'focal_alpha', 'focal_gamma'))
def _device_forward(pred_logits, pred_ctrl, pred_text_logits,
                    tgt_pts, texts, lengths, *,
                    class_weight, coord_weight, focal_alpha, focal_gamma):
    bs, Nq, n_pts, _ = pred_logits.shape
    vocp1 = pred_text_logits.shape[3]
    voc = vocp1 - 1
    n_text_pts = pred_text_logits.shape[2]

    # (1) log_softmax over vocab (Pallas, row-tiled, unpadded V)
    M = bs * Nq * n_text_pts
    ls = log_softmax_pallas(pred_text_logits.reshape(M, vocp1))
    out_texts = ls.reshape(bs, Nq, n_text_pts, vocp1)

    # (2) block-diagonal focal + L1 cost (Pallas, batch on the grid)
    C_geo = cost_matrix_pallas(pred_logits[..., 0],
                               pred_ctrl.reshape(bs, Nq, n_pts * 2),
                               tgt_pts, class_weight, coord_weight,
                               focal_alpha, focal_gamma)

    # (3) CTC text cost, batched over bs with a lane-dense scan carry
    nll = jax.vmap(lambda lp, tx, ln: _ctc_nll_batched(lp, tx, ln, blank=voc))(
        out_texts, texts, lengths)                                   # (bs, T_max, Q)
    nll = jnp.where(jnp.isnan(nll) | (nll > 1e29), 0.0, nll)         # zero_infinity
    lens = lengths.astype(jnp.float32)[:, :, None]
    text_cost = jnp.where(lens > 0, nll / jnp.maximum(lens, 1.0), 0.0)
    return C_geo, jnp.transpose(text_cost, (0, 2, 1))                # (bs, Q, T_max)


# --------------------------------------------------------------------------
# host-side assignment
# --------------------------------------------------------------------------
def _lsa(cost):
    """Rectangular linear sum assignment (scipy if available)."""
    if _scipy_lsa is not None:
        return _scipy_lsa(cost)
    # TODO(synk): no scipy on this host — exact brute force for tiny problems,
    # greedy fallback otherwise (Hungarian has no Pallas equivalent anyway).
    nq, nt = cost.shape
    if nt <= 6:
        best, best_rows = None, None
        for rows in itertools.permutations(range(nq), nt):
            s = cost[list(rows), range(nt)].sum()
            if best is None or s < best:
                best, best_rows = s, rows
        return np.asarray(best_rows), np.arange(nt)
    rows, cols = [], []
    c = cost.astype(np.float64).copy()
    for _ in range(min(nq, nt)):
        r, cl = np.unravel_index(np.argmin(c), c.shape)
        rows.append(r)
        cols.append(cl)
        c[r, :] = np.inf
        c[:, cl] = np.inf
    order = np.argsort(cols)
    return np.asarray(rows)[order], np.asarray(cols)[order]


# --------------------------------------------------------------------------
# matcher forward
# --------------------------------------------------------------------------
def ctrl_point_hungarian_matcher(outputs, targets, class_weight=1.0,
                                 coord_weight=1.0, text_weight=1.0,
                                 focal_alpha=0.25, focal_gamma=2.0):
    pred_logits = outputs['pred_logits']
    pred_ctrl = outputs['pred_ctrl_points']
    pred_text_logits = outputs['pred_text_logits']
    bs, num_queries = pred_logits.shape[:2]
    n_pts = pred_ctrl.shape[2]
    voc = pred_text_logits.shape[3] - 1

    sizes = [int(np.asarray(v['ctrl_points']).shape[0]) for v in targets]
    if sum(sizes) == 0:
        return [(np.array([], dtype=np.int64), np.array([], dtype=np.int64))
                for _ in range(bs)]

    # bucketed (pow-2) static shapes -> stable jit cache, block-diagonal layout
    T_b = _next_pow2(max(max(sizes), 1))
    L_raw = 1
    for v in targets:
        t = np.asarray(v['texts'])
        if t.ndim == 2 and t.shape[1] > L_raw:
            L_raw = int(t.shape[1])
    L_b = _next_pow2(L_raw)
    tgt_np = np.zeros((bs, T_b, n_pts * 2), np.float32)
    txt_np = np.full((bs, T_b, L_b), voc, np.int32)   # pad token == blank == voc
    for b, v in enumerate(targets):
        n_t = sizes[b]
        if n_t == 0:
            continue
        ctrl = np.asarray(v['ctrl_points'], np.float32).reshape(n_t, n_pts * 2)
        txt = np.asarray(v['texts'])
        assert txt.min() >= 0 and txt.max() <= voc, \
            "texts must be in [0, voc]; pad token must equal blank (== voc)"
        tgt_np[b, :n_t] = ctrl
        txt_np[b, :n_t, :txt.shape[1]] = txt
    len_np = (txt_np != voc).sum(-1).astype(np.int32)  # (bs, T_b); padded rows -> 0

    C_geo, text_cost = _device_forward(
        jnp.asarray(pred_logits), jnp.asarray(pred_ctrl),
        jnp.asarray(pred_text_logits), jnp.asarray(tgt_np),
        jnp.asarray(txt_np), jnp.asarray(len_np),
        class_weight=float(class_weight), coord_weight=float(coord_weight),
        focal_alpha=float(focal_alpha), focal_gamma=float(focal_gamma))

    # single host sync / transfer before the host-only Hungarian solve
    C_geo, text_cost = jax.block_until_ready((C_geo, text_cost))
    C_np = np.asarray(C_geo)        # (bs, Nqp, Tp)  padded -> slice lazily here
    tcost_np = np.asarray(text_cost)  # (bs, Q, T_b)

    # TODO(synk): Hungarian assignment has no Pallas equivalent; host solve,
    # exactly as in the reference module.
    indices = []
    for b in range(bs):
        n_t = sizes[b]
        if n_t == 0:
            indices.append((np.array([], dtype=np.int64),
                            np.array([], dtype=np.int64)))
            continue
        c = C_np[b, :num_queries, :n_t] + text_weight * tcost_np[b, :, :n_t]
        row, col = _lsa(c)
        indices.append((np.asarray(row, np.int64), np.asarray(col, np.int64)))
    return indices


# --------------------------------------------------------------------------
# host-side numpy CTC (reference only, used by the sanity checks)
# --------------------------------------------------------------------------
def _ctc_nll(log_probs, target, blank):
    T_in = log_probs.shape[0]
    L = int(len(target))
    ext = np.full(2 * L + 1, blank, dtype=np.int64)
    ext[1::2] = target
    S = ext.shape[0]
    alpha = np.full(S, -np.inf, dtype=np.float64)
    alpha[0] = log_probs[0, blank]
    if S > 1:
        alpha[1] = log_probs[0, ext[1]]
    for t in range(1, T_in):
        prev = alpha
        alpha = np.full(S, -np.inf, dtype=np.float64)
        for s in range(S):
            a = prev[s]
            if s >= 1:
                a = np.logaddexp(a, prev[s - 1])
            if s >= 2 and ext[s] != blank and ext[s] != ext[s - 2]:
                a = np.logaddexp(a, prev[s - 2])
            alpha[s] = a + log_probs[t, ext[s]]
    ll = alpha[S - 1]
    if S > 1:
        ll = np.logaddexp(ll, alpha[S - 2])
    return -ll


# --------------------------------------------------------------------------
if __name__ == "__main__":
    key = jax.random.PRNGKey(0)
    bs, num_queries, n_pts, num_classes = 2, 8, 8, 1
    n_text_pts, voc, max_text_len = 16, 37, 6
    sizes = [3, 2]

    ks = jax.random.split(key, 16)
    outputs = {
        'pred_logits': jax.random.normal(
            ks[0], (bs, num_queries, n_pts, num_classes), jnp.float32),
        'pred_ctrl_points': jax.random.uniform(
            ks[1], (bs, num_queries, n_pts, 2), dtype=jnp.float32),
        'pred_text_logits': jax.random.normal(
            ks[2], (bs, num_queries, n_text_pts, voc + 1), jnp.float32),
    }
    targets = []
    k_idx = 3
    for n_t in sizes:
        ctrl = jax.random.uniform(ks[k_idx], (n_t, n_pts, 2), dtype=jnp.float32); k_idx += 1
        lens = np.asarray(jax.random.randint(ks[k_idx], (n_t,), 1, max_text_len + 1)); k_idx += 1
        toks = np.asarray(jax.random.randint(ks[k_idx], (n_t, max_text_len), 0, voc)); k_idx += 1
        texts = np.full((n_t, max_text_len), voc, dtype=np.int64)
        for j in range(n_t):
            texts[j, :int(lens[j])] = toks[j, :int(lens[j])]
        targets.append({'ctrl_points': ctrl, 'texts': jnp.asarray(texts)})

    indices = ctrl_point_hungarian_matcher(outputs, targets)

    # ---- sanity 1: Pallas log_softmax vs numpy reference --------------------
    lt = np.asarray(outputs['pred_text_logits'], np.float64).reshape(-1, voc + 1)
    mx = lt.max(-1, keepdims=True)
    ref_ls = lt - mx - np.log(np.exp(lt - mx).sum(-1, keepdims=True))
    pal_ls = np.asarray(jax.block_until_ready(
        log_softmax_pallas(jnp.asarray(lt, jnp.float32))))
    assert pal_ls.shape == ref_ls.shape
    assert np.allclose(pal_ls, ref_ls, rtol=1e-4, atol=1e-4), "log_softmax mismatch"

    # ---- sanity 2: Pallas block-diagonal cost kernel vs numpy reference -----
    logits0 = np.asarray(outputs['pred_logits'][..., 0], np.float64)          # (bs, Q, P)
    out_pts = np.asarray(outputs['pred_ctrl_points'],
                         np.float64).reshape(bs, num_queries, -1)             # (bs, Q, D)
    T_bucket = _next_pow2(max(sizes))
    tgt_pad = np.zeros((bs, T_bucket, n_pts * 2), np.float32)
    for b in range(bs):
        tgt_pad[b, :sizes[b]] = np.asarray(
            targets[b]['ctrl_points'], np.float32).reshape(sizes[b], -1)
    C_pal = np.asarray(jax.block_until_ready(cost_matrix_pallas(
        jnp.asarray(logits0, jnp.float32), jnp.asarray(out_pts, jnp.float32),
        jnp.asarray(tgt_pad), 1.0, 1.0, 0.25, 2.0)))
    for b in range(bs):
        prob = 1.0 / (1.0 + np.exp(-logits0[b]))
        neg = (1 - 0.25) * prob ** 2.0 * (-np.log1p(-prob))
        pos = 0.25 * (1 - prob) ** 2.0 * (-np.log(prob))
        cost_class = (pos - neg).mean(-1, keepdims=True)
        tb = tgt_pad[b, :sizes[b]].astype(np.float64)
        cdist = np.abs(out_pts[b][:, None, :] - tb[None, :, :]).sum(-1)
        C_ref = cost_class + cdist
        assert np.allclose(C_pal[b, :num_queries, :sizes[b]], C_ref,
                           rtol=2e-4, atol=2e-4), "cost kernel mismatch"

    # ---- sanity 3: batched device CTC vs numpy DP reference -----------------
    pal_ls4 = pal_ls.reshape(bs, num_queries, n_text_pts, voc + 1).astype(np.float32)
    for b in range(bs):
        texts_b = np.asarray(targets[b]['texts'])
        lens_b = (texts_b != voc).sum(-1)
        nll_jax = np.asarray(jax.block_until_ready(_ctc_nll_batched(
            jnp.asarray(pal_ls4[b]), jnp.asarray(texts_b, jnp.int32),
            jnp.asarray(lens_b, jnp.int32), blank=voc)))          # (n_t, Q)
        for t_idx in range(sizes[b]):
            for q in range(num_queries):
                ref = _ctc_nll(pal_ls4[b, q].astype(np.float64),
                               texts_b[t_idx, :int(lens_b[t_idx])], blank=voc)
                assert np.allclose(nll_jax[t_idx, q], ref, rtol=1e-3, atol=1e-3), \
                    "CTC mismatch"

    for row, col in indices:
        assert row.dtype == np.int64 and col.dtype == np.int64
        assert row.shape == col.shape
        assert len(np.unique(row)) == len(row) and len(np.unique(col)) == len(col)

    print("KERNEL_OK")
</pallas_src>

<mosaic_0001>
module attributes {stable_mosaic.version = 11 : i64} {
  func.func @_cost_kernel(%arg0: i32, %arg1: i32, %arg2: i32, %arg3: memref<1x8x24xf32, #tpu.memory_space<vmem>>, %arg4: memref<1x16x128xf32, #tpu.memory_space<vmem>>, %arg5: memref<1x8x128xf32, #tpu.memory_space<vmem>>) attributes {dimension_semantics = [#tpu.dimension_semantics<parallel>, #tpu.dimension_semantics<parallel>, #tpu.dimension_semantics<parallel>], iteration_bounds = array<i64: 2, 1, 1>, scalar_prefetch = 0 : i64, scratch_operands = 0 : i64, tpu.core_type = #tpu.core_type<tc>, window_params = [{transform_indices = @transform_0, window_bounds = array<i64: 1, 8, 24>}, {transform_indices = @transform_1, window_bounds = array<i64: 1, 16, 128>}, {transform_indices = @transform_2, window_bounds = array<i64: 1, 8, 128>}]} {
    %c0 = arith.constant 0 : index
    %c0_0 = arith.constant 0 : index
    %c0_1 = arith.constant 0 : index
    %0 = vector.load %arg3[%c0, %c0_0, %c0_1] : memref<1x8x24xf32, #tpu.memory_space<vmem>>, vector<1x8x24xf32>
    %1 = vector.shape_cast %0 : vector<1x8x24xf32> to vector<8x24xf32>
    %2 = vector.extract_strided_slice %1 {offsets = [0, 0], sizes = [8, 8], strides = [1, 1]} : vector<8x24xf32> to vector<8x8xf32>
    %3 = math.absf %2 : vector<8x8xf32>
    %cst = arith.constant 0.000000e+00 : f32
    %4 = vector.broadcast %cst : f32 to vector<8x8xf32>
    %5 = arith.subf %4, %3 : vector<8x8xf32>
    %6 = math.exp %5 : vector<8x8xf32>
    %cst_2 = arith.constant 1.000000e+00 : f32
    %7 = vector.broadcast %cst_2 : f32 to vector<8x8xf32>
    %8 = arith.addf %7, %6 : vector<8x8xf32>
    %9 = math.log %8 : vector<8x8xf32>
    %cst_3 = arith.constant 0.000000e+00 : f32
    %10 = vector.broadcast %cst_3 : f32 to vector<8x8xf32>
    %11 = arith.maximumf %2, %10 : vector<8x8xf32>
    %12 = arith.addf %11, %9 : vector<8x8xf32>
    %cst_4 = arith.constant 0.000000e+00 : f32
    %13 = vector.broadcast %cst_4 : f32 to vector<8x8xf32>
    %14 = arith.subf %13, %2 : vector<8x8xf32>
    %cst_5 = arith.constant 0.000000e+00 : f32
    %15 = vector.broadcast %cst_5 : f32 to vector<8x8xf32>
    %16 = arith.maximumf %14, %15 : vector<8x8xf32>
    %17 = arith.addf %16, %9 : vector<8x8xf32>
    %cst_6 = arith.constant 0.000000e+00 : f32
    %18 = vector.broadcast %cst_6 : f32 to vector<8x8xf32>
    %19 = arith.cmpf oge, %2, %18 : vector<8x8xf32>
    %cst_7 = arith.constant 1.000000e+00 : f32
    %20 = vector.broadcast %cst_7 : f32 to vector<8x8xf32>
    %21 = arith.select %19, %20, %6 : vector<8x8xi1>, vector<8x8xf32>
    %cst_8 = arith.constant 1.000000e+00 : f32
    %22 = vector.broadcast %cst_8 : f32 to vector<8x8xf32>
    %23 = arith.addf %22, %6 : vector<8x8xf32>
    %24 = arith.divf %21, %23 : vector<8x8xf32>
    %25 = arith.mulf %24, %24 : vector<8x8xf32>
    %cst_9 = arith.constant 7.500000e-01 : f32
    %26 = vector.broadcast %cst_9 : f32 to vector<8x8xf32>
    %27 = arith.mulf %26, %25 : vector<8x8xf32>
    %28 = arith.mulf %27, %12 : vector<8x8xf32>
    %cst_10 = arith.constant 1.000000e+00 : f32
    %29 = vector.broadcast %cst_10 : f32 to vector<8x8xf32>
    %30 = arith.subf %29, %24 : vector<8x8xf32>
    %31 = arith.mulf %30, %30 : vector<8x8xf32>
    %cst_11 = arith.constant 2.500000e-01 : f32
    %32 = vector.broadcast %cst_11 : f32 to vector<8x8xf32>
    %33 = arith.mulf %32, %31 : vector<8x8xf32>
    %34 = arith.mulf %33, %17 : vector<8x8xf32>
    %35 = arith.subf %34, %28 : vector<8x8xf32>
    %cst_12 = arith.constant dense<0.000000e+00> : vector<8xf32>
    %36 = vector.multi_reduction <add>, %35, %cst_12 [1] : vector<8x8xf32> to vector<8xf32>
    %37 = vector.shape_cast %36 : vector<8xf32> to vector<8x1xf32>
    %cst_13 = arith.constant 8.000000e+00 : f32
    %38 = vector.broadcast %cst_13 : f32 to vector<8x1xf32>
    %39 = arith.divf %37, %38 : vector<8x1xf32>
    %c0_14 = arith.constant 0 : index
    %c0_15 = arith.constant 0 : index
    %c0_16 = arith.constant 0 : index
    %40 = vector.load %arg4[%c0_14, %c0_15, %c0_16] : memref<1x16x128xf32, #tpu.memory_space<vmem>>, vector<1x16x128xf32>
    %41 = vector.shape_cast %40 : vector<1x16x128xf32> to vector<16x128xf32>
    %cst_17 = arith.constant 0.000000e+00 : f32
    %42 = vector.broadcast %cst_17 : f32 to vector<8x128xf32>
    %43 = vector.extract_strided_slice %1 {offsets = [0, 8], sizes = [8, 1], strides = [1, 1]} : vector<8x24xf32> to vector<8x1xf32>
    %44 = vector.extract_strided_slice %41 {offsets = [0, 0], sizes = [1, 128], strides = [1, 1]} : vector<16x128xf32> to vector<1x128xf32>
    %45 = vector.broadcast %43 : vector<8x1xf32> to vector<8x128xf32>
    %46 = vector.broadcast %44 : vector<1x128xf32> to vector<8x128xf32>
    %47 = arith.subf %45, %46 : vector<8x128xf32>
    %48 = math.absf %47 : vector<8x128xf32>
    %49 = arith.addf %42, %48 : vector<8x128xf32>
    %50 = vector.extract_strided_slice %1 {offsets = [0, 9], sizes = [8, 1], strides = [1, 1]} : vector<8x24xf32> to vector<8x1xf32>
    %51 = vector.extract_strided_slice %41 {offsets = [1, 0], sizes = [1, 128], strides = [1, 1]} : vector<16x128xf32> to vector<1x128xf32>
    %52 = vector.broadcast %50 : vector<8x1xf32> to vector<8x128xf32>
    %53 = vector.broadcast %51 : vector<1x128xf32> to vector<8x128xf32>
    %54 = arith.subf %52, %53 : vector<8x128xf32>
    %55 = math.absf %54 : vector<8x128xf32>
    %56 = arith.addf %49, %55 : vector<8x128xf32>
    %57 = vector.extract_strided_slice %1 {offsets = [0, 10], sizes = [8, 1], strides = [1, 1]} : vector<8x24xf32> to vector<8x1xf32>
    %58 = vector.extract_strided_slice %41 {offsets = [2, 0], sizes = [1, 128], strides = [1, 1]} : vector<16x128xf32> to vector<1x128xf32>
    %59 = vector.broadcast %57 : vector<8x1xf32> to vector<8x128xf32>
    %60 = vector.broadcast %58 : vector<1x128xf32> to vector<8x128xf32>
    %61 = arith.subf %59, %60 : vector<8x128xf32>
    %62 = math.absf %61 : vector<8x128xf32>
    %63 = arith.addf %56, %62 : vector<8x128xf32>
    %64 = vector.extract_strided_slice %1 {offsets = [0, 11], sizes = [8, 1], strides = [1, 1]} : vector<8x24xf32> to vector<8x1xf32>
    %65 = vector.extract_strided_slice %41 {offsets = [3, 0], sizes = [1, 128], strides = [1, 1]} : vector<16x128xf32> to vector<1x128xf32>
    %66 = vector.broadcast %64 : vector<8x1xf32> to vector<8x128xf32>
    %67 = vector.broadcast %65 : vector<1x128xf32> to vector<8x128xf32>
    %68 = arith.subf %66, %67 : vector<8x128xf32>
    %69 = math.absf %68 : vector<8x128xf32>
    %70 = arith.addf %63, %69 : vector<8x128xf32>
    %71 = vector.extract_strided_slice %1 {offsets = [0, 12], sizes = [8, 1], strides = [1, 1]} : vector<8x24xf32> to vector<8x1xf32>
    %72 = vector.extract_strided_slice %41 {offsets = [4, 0], sizes = [1, 128], strides = [1, 1]} : vector<16x128xf32> to vector<1x128xf32>
    %73 = vector.broadcast %71 : vector<8x1xf32> to vector<8x128xf32>
    %74 = vector.broadcast %72 : vector<1x128xf32> to vector<8x128xf32>
    %75 = arith.subf %73, %74 : vector<8x128xf32>
    %76 = math.absf %75 : vector<8x128xf32>
    %77 = arith.addf %70, %76 : vector<8x128xf32>
    %78 = vector.extract_strided_slice %1 {offsets = [0, 13], sizes = [8, 1], strides = [1, 1]} : vector<8x24xf32> to vector<8x1xf32>
    %79 = vector.extract_strided_slice %41 {offsets = [5, 0], sizes = [1, 128], strides = [1, 1]} : vector<16x128xf32> to vector<1x128xf32>
    %80 = vector.broadcast %78 : vector<8x1xf32> to vector<8x128xf32>
    %81 = vector.broadcast %79 : vector<1x128xf32> to vector<8x128xf32>
    %82 = arith.subf %80, %81 : vector<8x128xf32>
    %83 = math.absf %82 : vector<8x128xf32>
    %84 = arith.addf %77, %83 : vector<8x128xf32>
    %85 = vector.extract_strided_slice %1 {offsets = [0, 14], sizes = [8, 1], strides = [1, 1]} : vector<8x24xf32> to vector<8x1xf32>
    %86 = vector.extract_strided_slice %41 {offsets = [6, 0], sizes = [1, 128], strides = [1, 1]} : vector<16x128xf32> to vector<1x128xf32>
    %87 = vector.broadcast %85 : vector<8x1xf32> to vector<8x128xf32>
    %88 = vector.broadcast %86 : vector<1x128xf32> to vector<8x128xf32>
    %89 = arith.subf %87, %88 : vector<8x128xf32>
    %90 = math.absf %89 : vector<8x128xf32>
    %91 = arith.addf %84, %90 : vector<8x128xf32>
    %92 = vector.extract_strided_slice %1 {offsets = [0, 15], sizes = [8, 1], strides = [1, 1]} : vector<8x24xf32> to vector<8x1xf32>
    %93 = vector.extract_strided_slice %41 {offsets = [7, 0], sizes = [1, 128], strides = [1, 1]} : vector<16x128xf32> to vector<1x128xf32>
    %94 = vector.broadcast %92 : vector<8x1xf32> to vector<8x128xf32>
    %95 = vector.broadcast %93 : vector<1x128xf32> to vector<8x128xf32>
    %96 = arith.subf %94, %95 : vector<8x128xf32>
    %97 = math.absf %96 : vector<8x128xf32>
    %98 = arith.addf %91, %97 : vector<8x128xf32>
    %99 = vector.extract_strided_slice %1 {offsets = [0, 16], sizes = [8, 1], strides = [1, 1]} : vector<8x24xf32> to vector<8x1xf32>
    %100 = vector.extract_strided_slice %41 {offsets = [8, 0], sizes = [1, 128], strides = [1, 1]} : vector<16x128xf32> to vector<1x128xf32>
    %101 = vector.broadcast %99 : vector<8x1xf32> to vector<8x128xf32>
    %102 = vector.broadcast %100 : vector<1x128xf32> to vector<8x128xf32>
    %103 = arith.subf %101, %102 : vector<8x128xf32>
    %104 = math.absf %103 : vector<8x128xf32>
    %105 = arith.addf %98, %104 : vector<8x128xf32>
    %106 = vector.extract_strided_slice %1 {offsets = [0, 17], sizes = [8, 1], strides = [1, 1]} : vector<8x24xf32> to vector<8x1xf32>
    %107 = vector.extract_strided_slice %41 {offsets = [9, 0], sizes = [1, 128], strides = [1, 1]} : vector<16x128xf32> to vector<1x128xf32>
    %108 = vector.broadcast %106 : vector<8x1xf32> to vector<8x128xf32>
    %109 = vector.broadcast %107 : vector<1x128xf32> to vector<8x128xf32>
    %110 = arith.subf %108, %109 : vector<8x128xf32>
    %111 = math.absf %110 : vector<8x128xf32>
    %112 = arith.addf %105, %111 : vector<8x128xf32>
    %113 = vector.extract_strided_slice %1 {offsets = [0, 18], sizes = [8, 1], strides = [1, 1]} : vector<8x24xf32> to vector<8x1xf32>
    %114 = vector.extract_strided_slice %41 {offsets = [10, 0], sizes = [1, 128], strides = [1, 1]} : vector<16x128xf32> to vector<1x128xf32>
    %115 = vector.broadcast %113 : vector<8x1xf32> to vector<8x128xf32>
    %116 = vector.broadcast %114 : vector<1x128xf32> to vector<8x128xf32>
    %117 = arith.subf %115, %116 : vector<8x128xf32>
    %118 = math.absf %117 : vector<8x128xf32>
    %119 = arith.addf %112, %118 : vector<8x128xf32>
    %120 = vector.extract_strided_slice %1 {offsets = [0, 19], sizes = [8, 1], strides = [1, 1]} : vector<8x24xf32> to vector<8x1xf32>
    %121 = vector.extract_strided_slice %41 {offsets = [11, 0], sizes = [1, 128], strides = [1, 1]} : vector<16x128xf32> to vector<1x128xf32>
    %122 = vector.broadcast %120 : vector<8x1xf32> to vector<8x128xf32>
    %123 = vector.broadcast %121 : vector<1x128xf32> to vector<8x128xf32>
    %124 = arith.subf %122, %123 : vector<8x128xf32>
    %125 = math.absf %124 : vector<8x128xf32>
    %126 = arith.addf %119, %125 : vector<8x128xf32>
    %127 = vector.extract_strided_slice %1 {offsets = [0, 20], sizes = [8, 1], strides = [1, 1]} : vector<8x24xf32> to vector<8x1xf32>
    %128 = vector.extract_strided_slice %41 {offsets = [12, 0], sizes = [1, 128], strides = [1, 1]} : vector<16x128xf32> to vector<1x128xf32>
    %129 = vector.broadcast %127 : vector<8x1xf32> to vector<8x128xf32>
    %130 = vector.broadcast %128 : vector<1x128xf32> to vector<8x128xf32>
    %131 = arith.subf %129, %130 : vector<8x128xf32>
    %132 = math.absf %131 : vector<8x128xf32>
    %133 = arith.addf %126, %132 : vector<8x128xf32>
    %134 = vector.extract_strided_slice %1 {offsets = [0, 21], sizes = [8, 1], strides = [1, 1]} : vector<8x24xf32> to vector<8x1xf32>
    %135 = vector.extract_strided_slice %41 {offsets = [13, 0], sizes = [1, 128], strides = [1, 1]} : vector<16x128xf32> to vector<1x128xf32>
    %136 = vector.broadcast %134 : vector<8x1xf32> to vector<8x128xf32>
    %137 = vector.broadcast %135 : vector<1x128xf32> to vector<8x128xf32>
    %138 = arith.subf %136, %137 : vector<8x128xf32>
    %139 = math.absf %138 : vector<8x128xf32>
    %140 = arith.addf %133, %139 : vector<8x128xf32>
    %141 = vector.extract_strided_slice %1 {offsets = [0, 22], sizes = [8, 1], strides = [1, 1]} : vector<8x24xf32> to vector<8x1xf32>
    %142 = vector.extract_strided_slice %41 {offsets = [14, 0], sizes = [1, 128], strides = [1, 1]} : vector<16x128xf32> to vector<1x128xf32>
    %143 = vector.broadcast %141 : vector<8x1xf32> to vector<8x128xf32>
    %144 = vector.broadcast %142 : vector<1x128xf32> to vector<8x128xf32>
    %145 = arith.subf %143, %144 : vector<8x128xf32>
    %146 = math.absf %145 : vector<8x128xf32>
    %147 = arith.addf %140, %146 : vector<8x128xf32>
    %148 = vector.extract_strided_slice %1 {offsets = [0, 23], sizes = [8, 1], strides = [1, 1]} : vector<8x24xf32> to vector<8x1xf32>
    %149 = vector.extract_strided_slice %41 {offsets = [15, 0], sizes = [1, 128], strides = [1, 1]} : vector<16x128xf32> to vector<1x128xf32>
    %150 = vector.broadcast %148 : vector<8x1xf32> to vector<8x128xf32>
    %151 = vector.broadcast %149 : vector<1x128xf32> to vector<8x128xf32>
    %152 = arith.subf %150, %151 : vector<8x128xf32>
    %153 = math.absf %152 : vector<8x128xf32>
    %154 = arith.addf %147, %153 : vector<8x128xf32>
    %cst_18 = arith.constant 1.000000e+00 : f32
    %155 = vector.broadcast %cst_18 : f32 to vector<8x1xf32>
    %156 = arith.mulf %155, %39 : vector<8x1xf32>
    %cst_19 = arith.constant 1.000000e+00 : f32
    %157 = vector.broadcast %cst_19 : f32 to vector<8x128xf32>
    %158 = arith.mulf %157, %154 : vector<8x128xf32>
    %159 = vector.broadcast %156 : vector<8x1xf32> to vector<8x128xf32>
    %160 = arith.addf %159, %158 : vector<8x128xf32>
    %c0_20 = arith.constant 0 : index
    %c0_21 = arith.constant 0 : index
    %c0_22 = arith.constant 0 : index
    %161 = vector.load %arg5[%c0_20, %c0_21, %c0_22] : memref<1x8x128xf32, #tpu.memory_space<vmem>>, vector<1x8x128xf32>
    %162 = vector.shape_cast %161 : vector<1x8x128xf32> to vector<8x128xf32>
    %163 = vector.shape_cast %160 : vector<8x128xf32> to vector<1x8x128xf32>
    tpu.vector_store %arg5[%c0_20, %c0_21, %c0_22], %163 {strides = array<i32>} : memref<1x8x128xf32, #tpu.memory_space<vmem>>, vector<1x8x128xf32>,
    return
  }
  func.func @transform_0(%arg0: i32, %arg1: i32, %arg2: i32) -> (i32, i32, i32) {
    %c0_i32 = arith.constant 0 : i32
    %c0_i32_0 = arith.constant 0 : i32
    return %arg0, %arg1, %c0_i32 : i32, i32, i32
  }
  func.func @transform_1(%arg0: i32, %arg1: i32, %arg2: i32) -> (i32, i32, i32) {
    %c0_i32 = arith.constant 0 : i32
    %c0_i32_0 = arith.constant 0 : i32
    return %arg0, %c0_i32, %arg2 : i32, i32, i32
  }
  func.func @transform_2(%arg0: i32, %arg1: i32, %arg2: i32) -> (i32, i32, i32) {
    %c0_i32 = arith.constant 0 : i32
    return %arg0, %arg1, %arg2 : i32, i32, i32
  }
}

module attributes {stable_mosaic.version = 11 : i64} {
  func.func @_log_softmax_kernel(%arg0: i32, %arg1: memref<256x38xf32, #tpu.memory_space<vmem>>, %arg2: memref<256x38xf32, #tpu.memory_space<vmem>>) attributes {dimension_semantics = [#tpu.dimension_semantics<parallel>], iteration_bounds = array<i64: 1>, scalar_prefetch = 0 : i64, scratch_operands = 0 : i64, tpu.core_type = #tpu.core_type<tc>, window_params = [{transform_indices = @transform_0, window_bounds = array<i64: 256, 38>}, {transform_indices = @transform_1, window_bounds = array<i64: 256, 38>}]} {
    %c0 = arith.constant 0 : index
    %c0_0 = arith.constant 0 : index
    %0 = vector.load %arg1[%c0, %c0_0] : memref<256x38xf32, #tpu.memory_space<vmem>>, vector<256x38xf32>
    %cst = arith.constant dense<0xFF800000> : vector<256xf32>
    %1 = vector.multi_reduction <maximumf>, %0, %cst [1] : vector<256x38xf32> to vector<256xf32>
    %2 = vector.shape_cast %1 : vector<256xf32> to vector<256x1xf32>
    %3 = vector.broadcast %2 : vector<256x1xf32> to vector<256x38xf32>
    %4 = arith.subf %0, %3 : vector<256x38xf32>
    %5 = math.exp %4 : vector<256x38xf32>
    %cst_1 = arith.constant dense<0.000000e+00> : vector<256xf32>
    %6 = vector.multi_reduction <add>, %5, %cst_1 [1] : vector<256x38xf32> to vector<256xf32>
    %7 = vector.shape_cast %6 : vector<256xf32> to vector<256x1xf32>
    %8 = math.log %7 : vector<256x1xf32>
    %9 = vector.broadcast %8 : vector<256x1xf32> to vector<256x38xf32>
    %10 = arith.subf %4, %9 : vector<256x38xf32>
    %c0_2 = arith.constant 0 : index
    %c0_3 = arith.constant 0 : index
    %11 = vector.load %arg2[%c0_2, %c0_3] : memref<256x38xf32, #tpu.memory_space<vmem>>, vector<256x38xf32>
    tpu.vector_store %arg2[%c0_2, %c0_3], %10 {strides = array<i32>} : memref<256x38xf32, #tpu.memory_space<vmem>>, vector<256x38xf32>,
    return
  }
  func.func @transform_0(%arg0: i32) -> (i32, i32) {
    %c0_i32 = arith.constant 0 : i32
    %c0_i32_0 = arith.constant 0 : i32
    return %arg0, %c0_i32 : i32, i32
  }
  func.func @transform_1(%arg0: i32) -> (i32, i32) {
    %c0_i32 = arith.constant 0 : i32
    %c0_i32_0 = arith.constant 0 : i32
    return %arg0, %c0_i32 : i32, i32
  }
}

</mosaic_0001>

<bundles_post_ra>
// kernel: _device_forward.2
= control target key start
LH: loop header
LB: loop body
LE: loop exit
PB: predicated region body
PF: predicated region fallthrough
CT: control target
= control target key end

     0   :  { %vm40_vm0 = vcmask 310272   ;;  %s1143_s0 = inlined_call_operand.vmem [shape: f32[256,38], index: 0, kind: input, shape index: {}]   ;;  %s1144_s1 = inlined_call_operand.vmem [shape: f32[256,38], index: 1, kind: output, shape index: {}]  }
   0x1   :  { %v602_v0 = vld [vmem:[%s1143_s0] sm:$0xff]  ;;  %v607_v1 = vld [vmem:[%s1143_s0 + $0x10] sm:$0xff]  ;;  %v612_v2 = vld [vmem:[%s1143_s0 + $0x8] sm:$0xff] }
   0x2   :  { %v41_v3 = vsel %vm40_vm0, %v602_v0, -inf  ;;  %v47_v4 = vsel %vm40_vm0, %v607_v1, -inf  ;;  %v621_v5 = vld [vmem:[%s1143_s0 + $0x18] sm:$0xff]  ;;  %v44_v6 = vsel %vm40_vm0, %v612_v2, -inf  ;;  %v630_v8 = vld [vmem:[%s1143_s0 + $0x20] sm:$0xff]  ;;  %v635_v9 = vld [vmem:[%s1143_s0 + $0x28] sm:$0xff] }
   0x3   :  { %42 = vmax.xlane.f32.xlu0 %v41_v3  ;;  %48 = vmax.xlane.f32.xlu1 %v47_v4  ;;  %v50_v7 = vsel %vm40_vm0, %v621_v5, -inf  ;;  %v53_v10 = vsel %vm40_vm0, %v630_v8, -inf  ;;  %v56_v11 = vsel %vm40_vm0, %v635_v9, -inf  ;;  %v644_v12 = vld [vmem:[%s1143_s0 + $0x30] sm:$0xff]  ;;  %v649_v13 = vld [vmem:[%s1143_s0 + $0x38] sm:$0xff]  ;;  %v658_v16 = vld [vmem:[%s1143_s0 + $0x40] sm:$0xff] }
   0x4   :  { %v59_v14 = vsel %vm40_vm0, %v644_v12, -inf  ;;  %v62_v15 = vsel %vm40_vm0, %v649_v13, -inf  ;;  %v663_v17 = vld [vmem:[%s1143_s0 + $0x48] sm:$0xff]  ;;  %v65_v18 = vsel %vm40_vm0, %v658_v16, -inf  ;;  %v672_v20 = vld [vmem:[%s1143_s0 + $0x50] sm:$0xff]  ;;  %v677_v21 = vld [vmem:[%s1143_s0 + $0x58] sm:$0xff] }
   0x5   :  { %v68_v19 = vsel %vm40_vm0, %v663_v17, -inf  ;;  %v71_v22 = vsel %vm40_vm0, %v672_v20, -inf  ;;  %v74_v23 = vsel %vm40_vm0, %v677_v21, -inf  ;;  %v686_v24 = vld [vmem:[%s1143_s0 + $0x60] sm:$0xff]  ;;  %v691_v25 = vld [vmem:[%s1143_s0 + $0x68] sm:$0xff]  ;;  %v700_v28 = vld [vmem:[%s1143_s0 + $0x70] sm:$0xff] }
   0x6   :  { %v77_v26 = vsel %vm40_vm0, %v686_v24, -inf  ;;  %v80_v27 = vsel %vm40_vm0, %v691_v25, -inf  ;;  %v705_v29 = vld [vmem:[%s1143_s0 + $0x78] sm:$0xff]  ;;  %v83_v30 = vsel %vm40_vm0, %v700_v28, -inf  ;;  %v714_v32 = vld [vmem:[%s1143_s0 + $0x80] sm:$0xff]  ;;  %v719_v33 = vld [vmem:[%s1143_s0 + $0x88] sm:$0xff] }
   0x7   :  { %45 = vmax.xlane.f32.xlu0 %v44_v6  ;;  %51 = vmax.xlane.f32.xlu1 %v50_v7  ;;  %v86_v31 = vsel %vm40_vm0, %v705_v29, -inf  ;;  %v89_v34 = vsel %vm40_vm0, %v714_v32, -inf  ;;  %v92_v35 = vsel %vm40_vm0, %v719_v33, -inf  ;;  %v728_v36 = vld [vmem:[%s1143_s0 + $0x90] sm:$0xff]  ;;  %v733_v37 = vld [vmem:[%s1143_s0 + $0x98] sm:$0xff]  ;;  %v742_v40 = vld [vmem:[%s1143_s0 + $0xa0] sm:$0xff] }
   0x8   :  { %v95_v38 = vsel %vm40_vm0, %v728_v36, -inf  ;;  %v98_v39 = vsel %vm40_vm0, %v733_v37, -inf  ;;  %v747_v41 = vld [vmem:[%s1143_s0 + $0xa8] sm:$0xff]  ;;  %v101_v42 = vsel %vm40_vm0, %v742_v40, -inf  ;;  %v756_v44 = vld [vmem:[%s1143_s0 + $0xb0] sm:$0xff]  ;;  %v761_v45 = vld [vmem:[%s1143_s0 + $0xb8] sm:$0xff] }
   0x9   :  { %v104_v43 = vsel %vm40_vm0, %v747_v41, -inf  ;;  %v107_v46 = vsel %vm40_vm0, %v756_v44, -inf  ;;  %v110_v47 = vsel %vm40_vm0, %v761_v45, -inf  ;;  %v770_v48 = vld [vmem:[%s1143_s0 + $0xc0] sm:$0xff]  ;;  %v775_v49 = vld [vmem:[%s1143_s0 + $0xc8] sm:$0xff]  ;;  %v784_v52 = vld [vmem:[%s1143_s0 + $0xd0] sm:$0xff] }
   0xa   :  { %v113_v50 = vsel %vm40_vm0, %v770_v48, -inf  ;;  %v116_v51 = vsel %vm40_vm0, %v775_v49, -inf  ;;  %v789_v53 = vld [vmem:[%s1143_s0 + $0xd8] sm:$0xff]  ;;  %v119_v54 = vsel %vm40_vm0, %v784_v52, -inf  ;;  %v798_v56 = vld [vmem:[%s1143_s0 + $0xe0] sm:$0xff]  ;;  %v803_v57 = vld [vmem:[%s1143_s0 + $0xe8] sm:$0xff] }
   0xb   :  { %54 = vmax.xlane.f32.xlu0 %v53_v10  ;;  %57 = vmax.xlane.f32.xlu1 %v56_v11  ;;  %v122_v55 = vsel %vm40_vm0, %v789_v53, -inf  ;;  %v125_v58 = vsel %vm40_vm0, %v798_v56, -inf  ;;  %v128_v59 = vsel %vm40_vm0, %v803_v57, -inf  ;;  %v812_v60 = vld [vmem:[%s1143_s0 + $0xf0] sm:$0xff]  ;;  %v817_v61 = vld [vmem:[%s1143_s0 + $0xf8] sm:$0xff] }
   0xc   :  { %v131_v62 = vsel %vm40_vm0, %v812_v60, -inf  ;;  %v134_v63 = vsel %vm40_vm0, %v817_v61, -inf }
   0xf   :  { %60 = vmax.xlane.f32.xlu0 %v59_v14  ;;  %63 = vmax.xlane.f32.xlu1 %v62_v15 }
  0x13   :  { %66 = vmax.xlane.f32.xlu0 %v65_v18  ;;  %69 = vmax.xlane.f32.xlu1 %v68_v19 }
  0x17   :  { %72 = vmax.xlane.f32.xlu0 %v71_v22  ;;  %75 = vmax.xlane.f32.xlu1 %v74_v23 }
  0x1b   :  { %78 = vmax.xlane.f32.xlu0 %v77_v26  ;;  %81 = vmax.xlane.f32.xlu1 %v80_v27 }
  0x1f   :  { %84 = vmax.xlane.f32.xlu0 %v83_v30  ;;  %87 = vmax.xlane.f32.xlu1 %v86_v31 }
  0x23   :  { %90 = vmax.xlane.f32.xlu0 %v89_v34  ;;  %93 = vmax.xlane.f32.xlu1 %v92_v35 }
  0x27   :  { %96 = vmax.xlane.f32.xlu0 %v95_v38  ;;  %99 = vmax.xlane.f32.xlu1 %v98_v39 }
  0x2b   :  { %102 = vmax.xlane.f32.xlu0 %v101_v42  ;;  %105 = vmax.xlane.f32.xlu1 %v104_v43 }
  0x2f   :  { %108 = vmax.xlane.f32.xlu0 %v107_v46  ;;  %111 = vmax.xlane.f32.xlu1 %v110_v47 }
  0x33   :  { %114 = vmax.xlane.f32.xlu0 %v113_v50  ;;  %117 = vmax.xlane.f32.xlu1 %v116_v51 }
  0x37   :  { %120 = vmax.xlane.f32.xlu0 %v119_v54  ;;  %123 = vmax.xlane.f32.xlu1 %v122_v55 }
  0x3b   :  { %126 = vmax.xlane.f32.xlu0 %v125_v58  ;;  %129 = vmax.xlane.f32.xlu1 %v128_v59 }
  0x3f   :  { %132 = vmax.xlane.f32.xlu0 %v131_v62  ;;  %135 = vmax.xlane.f32.xlu1 %v134_v63 }
  0x90   :  { %v43_v3 = vpop.xlane.xlu0 %42  ;;  %v49_v4 = vpop.xlane.xlu1 %48 }
  0x91   :  { %v824_v6 = vsub.f32 %v602_v0, %v43_v3  ;;  %v827_v7 = vsub.f32 %v607_v1, %v49_v4 }
  0x93   :  { %v169_v10 = vmul.f32 1.442695, %v824_v6  ;;  %v173_v11 = vmul.f32 1.442695, %v827_v7 }
  0x94   :  { %v46_v14 = vpop.xlane.xlu0 %45  ;;  %v52_v15 = vpop.xlane.xlu1 %51 }
  0x95   :  { %461 = vpow2.f32 %v169_v10  ;;  %v832_v18 = vsub.f32 %v612_v2, %v46_v14  ;;  %v835_v19 = vsub.f32 %v621_v5, %v52_v15 }
  0x96   :  { %463 = vpow2.f32 %v173_v11 }
  0x97   :  { %v171_v0 = vmul.f32 1.442695, %v832_v18  ;;  %v175_v22 = vmul.f32 1.442695, %v835_v19 }
  0x98   :  { %v55_v1 = vpop.xlane.xlu0 %54  ;;  %v58_v23 = vpop.xlane.xlu1 %57 }
  0x99   :  { %465 = vpow2.f32 %v171_v0  ;;  %v840_v26 = vsub.f32 %v630_v8, %v55_v1  ;;  %v843_v27 = vsub.f32 %v635_v9, %v58_v23 }
  0x9a   :  { %467 = vpow2.f32 %v175_v22 }
  0x9b   :  { %v177_v2 = vmul.f32 1.442695, %v840_v26  ;;  %v179_v5 = vmul.f32 1.442695, %v843_v27 }
  0x9c   :  { %v61_v30 = vpop.xlane.xlu0 %60  ;;  %v64_v31 = vpop.xlane.xlu1 %63 }
  0x9d   :  { %469 = vpow2.f32 %v177_v2  ;;  %v848_v34 = vsub.f32 %v644_v12, %v61_v30  ;;  %v851_v35 = vsub.f32 %v649_v13, %v64_v31 }
  0x9e   :  { %471 = vpow2.f32 %v179_v5 }
  0x9f   :  { %v462_v8 = vpop.eup %461  ;;  %v181_v38 = vmul.f32 1.442695, %v848_v34  ;;  %v183_v9 = vmul.f32 1.442695, %v851_v35 }
  0xa0   :  { %v464_v39 = vpop.eup %463  ;;  %v67_v42 = vpop.xlane.xlu0 %66  ;;  %v233_v43 = vsel %vm40_vm0, %v462_v8, 0.0 }
  0xa1   :  { %v70_v46 = vpop.xlane.xlu1 %69  ;;  %473 = vpow2.f32 %v181_v38  ;;  %v857_v47 = vsub.f32 %v658_v16, %v67_v42  ;;  %234 = vadd.xlane.f32.xlu0 %v233_v43  ;;  %v239_v13 = vsel %vm40_vm0, %v464_v39, 0.0 }
  0xa2   :  { %v860_v12 = vsub.f32 %v663_v17, %v70_v46  ;;  %475 = vpow2.f32 %v183_v9 }
  0xa3   :  { %v466_v50 = vpop.eup %465  ;;  %v185_v51 = vmul.f32 1.442695, %v857_v47 }
  0xa4   :  { %v187_v54 = vmul.f32 1.442695, %v860_v12  ;;  %v468_v55 = vpop.eup %467  ;;  %v73_v58 = vpop.xlane.xlu0 %72  ;;  %v236_v59 = vsel %vm40_vm0, %v466_v50, 0.0 }
  0xa5   :  { %v76_v62 = vpop.xlane.xlu1 %75  ;;  %477 = vpow2.f32 %v185_v51  ;;  %v867_v16 = vsub.f32 %v672_v20, %v73_v58  ;;  %240 = vadd.xlane.f32.xlu0 %v239_v13  ;;  %237 = vadd.xlane.f32.xlu1 %v236_v59  ;;  %v242_v63 = vsel %vm40_vm0, %v468_v55, 0.0 }
  0xa6   :  { %v870_v17 = vsub.f32 %v677_v21, %v76_v62  ;;  %479 = vpow2.f32 %v187_v54 }
  0xa7   :  { %v470_v3 = vpop.eup %469  ;;  %v189_v4 = vmul.f32 1.442695, %v867_v16 }
  0xa8   :  { %v191_v10 = vmul.f32 1.442695, %v870_v17  ;;  %v472_v11 = vpop.eup %471  ;;  %v79_v14 = vpop.xlane.xlu0 %78  ;;  %v245_v15 = vsel %vm40_vm0, %v470_v3, 0.0 }
  0xa9   :  { %v82_v0 = vpop.xlane.xlu1 %81  ;;  %481 = vpow2.f32 %v189_v4  ;;  %v877_v20 = vsub.f32 %v686_v24, %v79_v14  ;;  %243 = vadd.xlane.f32.xlu1 %v242_v63  ;;  %246 = vadd.xlane.f32.xlu0 %v245_v15  ;;  %v248_v22 = vsel %vm40_vm0, %v472_v11, 0.0 }
  0xaa   :  { %v880_v21 = vsub.f32 %v691_v25, %v82_v0  ;;  %483 = vpow2.f32 %v191_v10 }
  0xab   :  { %v474_v1 = vpop.eup %473  ;;  %v193_v23 = vmul.f32 1.442695, %v877_v20 }
  0xac   :  { %v195_v2 = vmul.f32 1.442695, %v880_v21  ;;  %v476_v5 = vpop.eup %475  ;;  %v85_v30 = vpop.xlane.xlu0 %84  ;;  %v251_v31 = vsel %vm40_vm0, %v474_v1, 0.0 }
  0xad   :  { %v88_v8 = vpop.xlane.xlu1 %87  ;;  %485 = vpow2.f32 %v193_v23  ;;  %v887_v24 = vsub.f32 %v700_v28, %v85_v30  ;;  %249 = vadd.xlane.f32.xlu1 %v248_v22  ;;  %252 = vadd.xlane.f32.xlu0 %v251_v31  ;;  %v254_v38 = vsel %vm40_vm0, %v476_v5, 0.0 }
  0xae   :  { %v890_v25 = vsub.f32 %v705_v29, %v88_v8  ;;  %487 = vpow2.f32 %v195_v2 }
  0xaf   :  { %v478_v9 = vpop.eup %477  ;;  %v197_v39 = vmul.f32 1.442695, %v887_v24 }
  0xb0   :  { %v199_v42 = vmul.f32 1.442695, %v890_v25  ;;  %v480_v43 = vpop.eup %479  ;;  %v91_v46 = vpop.xlane.xlu0 %90  ;;  %v257_v13 = vsel %vm40_vm0, %v478_v9, 0.0 }
  0xb1   :  { %v94_v50 = vpop.xlane.xlu1 %93  ;;  %489 = vpow2.f32 %v197_v39  ;;  %v897_v28 = vsub.f32 %v714_v32, %v91_v46  ;;  %255 = vadd.xlane.f32.xlu1 %v254_v38  ;;  %258 = vadd.xlane.f32.xlu0 %v257_v13  ;;  %v260_v51 = vsel %vm40_vm0, %v480_v43, 0.0 }
  0xb2   :  { %v900_v29 = vsub.f32 %v719_v33, %v94_v50  ;;  %491 = vpow2.f32 %v199_v42 }
  0xb3   :  { %v482_v54 = vpop.eup %481  ;;  %v201_v55 = vmul.f32 1.442695, %v897_v28 }
  0xb4   :  { %v203_v58 = vmul.f32 1.442695, %v900_v29  ;;  %v484_v59 = vpop.eup %483  ;;  %v97_v62 = vpop.xlane.xlu0 %96  ;;  %v263_v63 = vsel %vm40_vm0, %v482_v54, 0.0 }
  0xb5   :  { %v100_v3 = vpop.xlane.xlu1 %99  ;;  %493 = vpow2.f32 %v201_v55  ;;  %v907_v32 = vsub.f32 %v728_v36, %v97_v62  ;;  %261 = vadd.xlane.f32.xlu1 %v260_v51  ;;  %264 = vadd.xlane.f32.xlu0 %v263_v63  ;;  %v266_v4 = vsel %vm40_vm0, %v484_v59, 0.0 }
  0xb6   :  { %v910_v33 = vsub.f32 %v733_v37, %v100_v3  ;;  %495 = vpow2.f32 %v203_v58 }
  0xb7   :  { %v486_v10 = vpop.eup %485  ;;  %v205_v11 = vmul.f32 1.442695, %v907_v32 }
  0xb8   :  { %v207_v14 = vmul.f32 1.442695, %v910_v33  ;;  %v488_v15 = vpop.eup %487  ;;  %v103_v0 = vpop.xlane.xlu0 %102  ;;  %v269_v22 = vsel %vm40_vm0, %v486_v10, 0.0 }
  0xb9   :  { %v106_v1 = vpop.xlane.xlu1 %105  ;;  %497 = vpow2.f32 %v205_v11  ;;  %v917_v36 = vsub.f32 %v742_v40, %v103_v0  ;;  %267 = vadd.xlane.f32.xlu1 %v266_v4  ;;  %270 = vadd.xlane.f32.xlu0 %v269_v22  ;;  %v272_v23 = vsel %vm40_vm0, %v488_v15, 0.0 }
  0xba   :  { %v920_v37 = vsub.f32 %v747_v41, %v106_v1  ;;  %499 = vpow2.f32 %v207_v14 }
  0xbb   :  { %v490_v2 = vpop.eup %489  ;;  %v209_v5 = vmul.f32 1.442695, %v917_v36 }
  0xbc   :  { %v211_v30 = vmul.f32 1.442695, %v920_v37  ;;  %v492_v31 = vpop.eup %491  ;;  %v109_v8 = vpop.xlane.xlu0 %108  ;;  %v275_v38 = vsel %vm40_vm0, %v490_v2, 0.0 }
  0xbd   :  { %v112_v9 = vpop.xlane.xlu1 %111  ;;  %501 = vpow2.f32 %v209_v5  ;;  %v927_v40 = vsub.f32 %v756_v44, %v109_v8  ;;  %273 = vadd.xlane.f32.xlu1 %v272_v23  ;;  %276 = vadd.xlane.f32.xlu0 %v275_v38  ;;  %v278_v39 = vsel %vm40_vm0, %v492_v31, 0.0 }
  0xbe   :  { %v930_v41 = vsub.f32 %v761_v45, %v112_v9  ;;  %503 = vpow2.f32 %v211_v30 }
  0xbf   :  { %v494_v42 = vpop.eup %493  ;;  %v213_v43 = vmul.f32 1.442695, %v927_v40 }
  0xc0   :  { %v215_v46 = vmul.f32 1.442695, %v930_v41  ;;  %v496_v13 = vpop.eup %495  ;;  %v115_v50 = vpop.xlane.xlu0 %114  ;;  %v281_v51 = vsel %vm40_vm0, %v494_v42, 0.0 }
  0xc1   :  { %v118_v54 = vpop.xlane.xlu1 %117  ;;  %505 = vpow2.f32 %v213_v43  ;;  %v937_v44 = vsub.f32 %v770_v48, %v115_v50  ;;  %279 = vadd.xlane.f32.xlu1 %v278_v39  ;;  %282 = vadd.xlane.f32.xlu0 %v281_v51  ;;  %v284_v55 = vsel %vm40_vm0, %v496_v13, 0.0 }
  0xc2   :  { %v940_v45 = vsub.f32 %v775_v49, %v118_v54  ;;  %507 = vpow2.f32 %v215_v46 }
  0xc3   :  { %v498_v58 = vpop.eup %497  ;;  %v217_v59 = vmul.f32 1.442695, %v937_v44 }
  0xc4   :  { %v219_v62 = vmul.f32 1.442695, %v940_v45  ;;  %v500_v63 = vpop.eup %499  ;;  %v121_v3 = vpop.xlane.xlu0 %120  ;;  %v287_v4 = vsel %vm40_vm0, %v498_v58, 0.0 }
  0xc5   :  { %v124_v10 = vpop.xlane.xlu1 %123  ;;  %509 = vpow2.f32 %v217_v59  ;;  %v947_v48 = vsub.f32 %v784_v52, %v121_v3  ;;  %285 = vadd.xlane.f32.xlu1 %v284_v55  ;;  %288 = vadd.xlane.f32.xlu0 %v287_v4  ;;  %v290_v11 = vsel %vm40_vm0, %v500_v63, 0.0 }
  0xc6   :  { %v950_v49 = vsub.f32 %v789_v53, %v124_v10  ;;  %511 = vpow2.f32 %v219_v62 }
  0xc7   :  { %v502_v14 = vpop.eup %501  ;;  %v221_v15 = vmul.f32 1.442695, %v947_v48 }
  0xc8   :  { %v223_v0 = vmul.f32 1.442695, %v950_v49  ;;  %v504_v22 = vpop.eup %503  ;;  %v127_v1 = vpop.xlane.xlu0 %126  ;;  %v293_v23 = vsel %vm40_vm0, %v502_v14, 0.0 }
  0xc9   :  { %v130_v2 = vpop.xlane.xlu1 %129  ;;  %513 = vpow2.f32 %v221_v15  ;;  %v957_v52 = vsub.f32 %v798_v56, %v127_v1  ;;  %291 = vadd.xlane.f32.xlu1 %v290_v11  ;;  %294 = vadd.xlane.f32.xlu0 %v293_v23  ;;  %v296_v5 = vsel %vm40_vm0, %v504_v22, 0.0 }
  0xca   :  { %v960_v53 = vsub.f32 %v803_v57, %v130_v2  ;;  %515 = vpow2.f32 %v223_v0 }
  0xcb   :  { %v506_v30 = vpop.eup %505  ;;  %v225_v31 = vmul.f32 1.442695, %v957_v52 }
  0xcc   :  { %v227_v8 = vmul.f32 1.442695, %v960_v53  ;;  %v508_v38 = vpop.eup %507  ;;  %v133_v9 = vpop.xlane.xlu0 %132  ;;  %v299_v39 = vsel %vm40_vm0, %v506_v30, 0.0 }
  0xcd   :  { %v136_v42 = vpop.xlane.xlu1 %135  ;;  %517 = vpow2.f32 %v225_v31  ;;  %v967_v56 = vsub.f32 %v812_v60, %v133_v9  ;;  %297 = vadd.xlane.f32.xlu1 %v296_v5  ;;  %300 = vadd.xlane.f32.xlu0 %v299_v39  ;;  %v302_v43 = vsel %vm40_vm0, %v508_v38, 0.0 }
  0xce   :  { %v970_v57 = vsub.f32 %v817_v61, %v136_v42  ;;  %519 = vpow2.f32 %v227_v8 }
  0xcf   :  { %v510_v46 = vpop.eup %509  ;;  %v229_v13 = vmul.f32 1.442695, %v967_v56 }
  0xd0   :  { %v231_v50 = vmul.f32 1.442695, %v970_v57  ;;  %v512_v51 = vpop.eup %511  ;;  %v305_v54 = vsel %vm40_vm0, %v510_v46, 0.0 }
  0xd1   :  { %521 = vpow2.f32 %v229_v13  ;;  %303 = vadd.xlane.f32.xlu1 %v302_v43  ;;  %306 = vadd.xlane.f32.xlu0 %v305_v54  ;;  %v308_v60 = vsel %vm40_vm0, %v512_v51, 0.0 }
  0xd2   :  { %523 = vpow2.f32 %v231_v50 }
  0xd3   :  { %v514_v55 = vpop.eup %513 }
  0xd4   :  { %v516_v61 = vpop.eup %515  ;;  %v311_v58 = vsel %vm40_vm0, %v514_v55, 0.0 }
  0xd5   :  { %309 = vadd.xlane.f32.xlu1 %v308_v60  ;;  %312 = vadd.xlane.f32.xlu0 %v311_v58  ;;  %v314_v59 = vsel %vm40_vm0, %v516_v61, 0.0 }
  0xd7   :  { %v518_v62 = vpop.eup %517 }
  0xd8   :  { %v520_v63 = vpop.eup %519  ;;  %v317_v3 = vsel %vm40_vm0, %v518_v62, 0.0 }
  0xd9   :  { %315 = vadd.xlane.f32.xlu1 %v314_v59  ;;  %318 = vadd.xlane.f32.xlu0 %v317_v3  ;;  %v320_v4 = vsel %vm40_vm0, %v520_v63, 0.0 }
  0xdb   :  { %v522_v10 = vpop.eup %521 }
  0xdc   :  { %v524_v11 = vpop.eup %523  ;;  %v323_v14 = vsel %vm40_vm0, %v522_v10, 0.0 }
  0xdd   :  { %321 = vadd.xlane.f32.xlu1 %v320_v4  ;;  %324 = vadd.xlane.f32.xlu0 %v323_v14  ;;  %v326_v15 = vsel %vm40_vm0, %v524_v11, 0.0 }
  0xe1   :  { %327 = vadd.xlane.f32.xlu1 %v326_v15 }
 0x12e   :  { %v235_v0 = vpop.xlane.xlu0 %234 }
 0x12f   :  { %525 = vlog2.f32 %v235_v0 }
 0x132   :  { %v238_v22 = vpop.xlane.xlu1 %237  ;;  %v241_v1 = vpop.xlane.xlu0 %240 }
 0x133   :  { %527 = vlog2.f32 %v238_v22 }
 0x134   :  { %529 = vlog2.f32 %v241_v1 }
 0x136   :  { %v244_v23 = vpop.xlane.xlu1 %243  ;;  %v247_v2 = vpop.xlane.xlu0 %246 }
 0x137   :  { %531 = vlog2.f32 %v244_v23 }
 0x138   :  { %533 = vlog2.f32 %v247_v2 }
 0x139   :  { %v526_v5 = vpop.eup %525 }
 0x13a   :  { %v330_v30 = vmul.f32 0.6931472, %v526_v5  ;;  %v250_v31 = vpop.xlane.xlu1 %249  ;;  %v253_v8 = vpop.xlane.xlu0 %252 }
 0x13b   :  { %535 = vlog2.f32 %v250_v31 }
 0x13c   :  { %v393_v38 = vsub.f32 %v824_v6, %v330_v30  ;;  %537 = vlog2.f32 %v253_v8 }
 0x13d   :  { %v528_v9 = vpop.eup %527 }
 0x13e   :  { %v530_v39 = vpop.eup %529  ;;  %425 = vst.msk [vmem:[%s1144_s1] sm:$0xff] %vm40_vm0, %v393_v38  ;;  %v332_v42 = vmul.f32 0.6931472, %v528_v9  ;;  %v256_v43 = vpop.xlane.xlu1 %255 }
 0x13f   :  { %v259_v46 = vpop.xlane.xlu0 %258  ;;  %v334_v13 = vmul.f32 0.6931472, %v530_v39  ;;  %539 = vlog2.f32 %v256_v43 }
 0x140   :  { %v394_v50 = vsub.f32 %v832_v18, %v332_v42  ;;  %541 = vlog2.f32 %v259_v46 }
 0x141   :  { %v532_v51 = vpop.eup %531  ;;  %v395_v54 = vsub.f32 %v827_v7, %v334_v13 }
 0x142   :  { %v534_v6 = vpop.eup %533  ;;  %426 = vst.msk [vmem:[%s1144_s1 + $0x8] sm:$0xff] %vm40_vm0, %v394_v50  ;;  %v336_v60 = vmul.f32 0.6931472, %v532_v51  ;;  %v262_v55 = vpop.xlane.xlu1 %261 }
 0x143   :  { %v265_v61 = vpop.xlane.xlu0 %264  ;;  %427 = vst.msk [vmem:[%s1144_s1 + $0x10] sm:$0xff] %vm40_vm0, %v395_v54  ;;  %v338_v58 = vmul.f32 0.6931472, %v534_v6  ;;  %543 = vlog2.f32 %v262_v55 }
 0x144   :  { %v396_v18 = vsub.f32 %v835_v19, %v336_v60  ;;  %545 = vlog2.f32 %v265_v61 }
 0x145   :  { %v536_v7 = vpop.eup %535  ;;  %v397_v59 = vsub.f32 %v840_v26, %v338_v58 }
 0x146   :  { %v538_v62 = vpop.eup %537  ;;  %428 = vst.msk [vmem:[%s1144_s1 + $0x18] sm:$0xff] %vm40_vm0, %v396_v18  ;;  %v340_v63 = vmul.f32 0.6931472, %v536_v7  ;;  %v268_v3 = vpop.xlane.xlu1 %267 }
 0x147   :  { %v271_v4 = vpop.xlane.xlu0 %270  ;;  %429 = vst.msk [vmem:[%s1144_s1 + $0x20] sm:$0xff] %vm40_vm0, %v397_v59  ;;  %v342_v10 = vmul.f32 0.6931472, %v538_v62  ;;  %547 = vlog2.f32 %v268_v3 }
 0x148   :  { %v398_v19 = vsub.f32 %v843_v27, %v340_v63  ;;  %549 = vlog2.f32 %v271_v4 }
 0x149   :  { %v540_v26 = vpop.eup %539  ;;  %v399_v11 = vsub.f32 %v848_v34, %v342_v10 }
 0x14a   :  { %v542_v14 = vpop.eup %541  ;;  %430 = vst.msk [vmem:[%s1144_s1 + $0x28] sm:$0xff] %vm40_vm0, %v398_v19  ;;  %v344_v15 = vmul.f32 0.6931472, %v540_v26  ;;  %v274_v0 = vpop.xlane.xlu1 %273 }
 0x14b   :  { %v277_v22 = vpop.xlane.xlu0 %276  ;;  %431 = vst.msk [vmem:[%s1144_s1 + $0x30] sm:$0xff] %vm40_vm0, %v399_v11  ;;  %v346_v1 = vmul.f32 0.6931472, %v542_v14  ;;  %551 = vlog2.f32 %v274_v0 }
 0x14c   :  { %v400_v27 = vsub.f32 %v851_v35, %v344_v15  ;;  %553 = vlog2.f32 %v277_v22 }
 0x14d   :  { %v544_v34 = vpop.eup %543  ;;  %v401_v23 = vsub.f32 %v857_v47, %v346_v1 }
 0x14e   :  { %v546_v2 = vpop.eup %545  ;;  %432 = vst.msk [vmem:[%s1144_s1 + $0x38] sm:$0xff] %vm40_vm0, %v400_v27  ;;  %v348_v5 = vmul.f32 0.6931472, %v544_v34  ;;  %v280_v30 = vpop.xlane.xlu1 %279 }
 0x14f   :  { %v283_v31 = vpop.xlane.xlu0 %282  ;;  %433 = vst.msk [vmem:[%s1144_s1 + $0x40] sm:$0xff] %vm40_vm0, %v401_v23  ;;  %v350_v8 = vmul.f32 0.6931472, %v546_v2  ;;  %555 = vlog2.f32 %v280_v30 }
 0x150   :  { %v402_v35 = vsub.f32 %v860_v12, %v348_v5  ;;  %557 = vlog2.f32 %v283_v31 }
 0x151   :  { %v548_v47 = vpop.eup %547  ;;  %v403_v38 = vsub.f32 %v867_v16, %v350_v8 }
 0x152   :  { %v550_v9 = vpop.eup %549  ;;  %434 = vst.msk [vmem:[%s1144_s1 + $0x48] sm:$0xff] %vm40_vm0, %v402_v35  ;;  %v352_v39 = vmul.f32 0.6931472, %v548_v47  ;;  %v286_v42 = vpop.xlane.xlu1 %285 }
 0x153   :  { %v289_v43 = vpop.xlane.xlu0 %288  ;;  %435 = vst.msk [vmem:[%s1144_s1 + $0x50] sm:$0xff] %vm40_vm0, %v403_v38  ;;  %v354_v46 = vmul.f32 0.6931472, %v550_v9  ;;  %559 = vlog2.f32 %v286_v42 }
 0x154   :  { %v404_v12 = vsub.f32 %v870_v17, %v352_v39  ;;  %561 = vlog2.f32 %v289_v43 }
 0x155   :  { %v552_v16 = vpop.eup %551  ;;  %v405_v13 = vsub.f32 %v877_v20, %v354_v46 }
 0x156   :  { %v554_v50 = vpop.eup %553  ;;  %436 = vst.msk [vmem:[%s1144_s1 + $0x58] sm:$0xff] %vm40_vm0, %v404_v12  ;;  %v356_v51 = vmul.f32 0.6931472, %v552_v16  ;;  %v292_v54 = vpop.xlane.xlu1 %291 }
 0x157   :  { %v295_v6 = vpop.xlane.xlu0 %294  ;;  %437 = vst.msk [vmem:[%s1144_s1 + $0x60] sm:$0xff] %vm40_vm0, %v405_v13  ;;  %v358_v60 = vmul.f32 0.6931472, %v554_v50  ;;  %563 = vlog2.f32 %v292_v54 }
 0x158   :  { %v406_v17 = vsub.f32 %v880_v21, %v356_v51  ;;  %565 = vlog2.f32 %v295_v6 }
 0x159   :  { %v556_v20 = vpop.eup %555  ;;  %v407_v55 = vsub.f32 %v887_v24, %v358_v60 }
 0x15a   :  { %v558_v61 = vpop.eup %557  ;;  %438 = vst.msk [vmem:[%s1144_s1 + $0x68] sm:$0xff] %vm40_vm0, %v406_v17  ;;  %v360_v58 = vmul.f32 0.6931472, %v556_v20  ;;  %v298_v18 = vpop.xlane.xlu1 %297 }
 0x15b   :  { %v301_v7 = vpop.xlane.xlu0 %300  ;;  %439 = vst.msk [vmem:[%s1144_s1 + $0x70] sm:$0xff] %vm40_vm0, %v407_v55  ;;  %v362_v59 = vmul.f32 0.6931472, %v558_v61  ;;  %567 = vlog2.f32 %v298_v18 }
 0x15c   :  { %v408_v21 = vsub.f32 %v890_v25, %v360_v58  ;;  %569 = vlog2.f32 %v301_v7 }
 0x15d   :  { %v560_v24 = vpop.eup %559  ;;  %v409_v62 = vsub.f32 %v897_v28, %v362_v59 }
 0x15e   :  { %v562_v63 = vpop.eup %561  ;;  %440 = vst.msk [vmem:[%s1144_s1 + $0x78] sm:$0xff] %vm40_vm0, %v408_v21  ;;  %v364_v3 = vmul.f32 0.6931472, %v560_v24  ;;  %v304_v4 = vpop.xlane.xlu1 %303 }
 0x15f   :  { %v307_v10 = vpop.xlane.xlu0 %306  ;;  %441 = vst.msk [vmem:[%s1144_s1 + $0x80] sm:$0xff] %vm40_vm0, %v409_v62  ;;  %v366_v19 = vmul.f32 0.6931472, %v562_v63  ;;  %571 = vlog2.f32 %v304_v4 }
 0x160   :  { %v410_v25 = vsub.f32 %v900_v29, %v364_v3  ;;  %573 = vlog2.f32 %v307_v10 }
 0x161   :  { %v564_v28 = vpop.eup %563  ;;  %v411_v26 = vsub.f32 %v907_v32, %v366_v19 }
 0x162   :  { %v566_v11 = vpop.eup %565  ;;  %442 = vst.msk [vmem:[%s1144_s1 + $0x88] sm:$0xff] %vm40_vm0, %v410_v25  ;;  %v368_v14 = vmul.f32 0.6931472, %v564_v28  ;;  %v310_v15 = vpop.xlane.xlu1 %309 }
 0x163   :  { %v313_v0 = vpop.xlane.xlu0 %312  ;;  %443 = vst.msk [vmem:[%s1144_s1 + $0x90] sm:$0xff] %vm40_vm0, %v411_v26  ;;  %v370_v22 = vmul.f32 0.6931472, %v566_v11  ;;  %575 = vlog2.f32 %v310_v15 }
 0x164   :  { %v412_v29 = vsub.f32 %v910_v33, %v368_v14  ;;  %577 = vlog2.f32 %v313_v0 }
 0x165   :  { %v568_v32 = vpop.eup %567  ;;  %v413_v1 = vsub.f32 %v917_v36, %v370_v22 }
 0x166   :  { %v570_v27 = vpop.eup %569  ;;  %444 = vst.msk [vmem:[%s1144_s1 + $0x98] sm:$0xff] %vm40_vm0, %v412_v29  ;;  %v372_v34 = vmul.f32 0.6931472, %v568_v32  ;;  %v316_v23 = vpop.xlane.xlu1 %315 }
 0x167   :  { %v319_v2 = vpop.xlane.xlu0 %318  ;;  %445 = vst.msk [vmem:[%s1144_s1 + $0xa0] sm:$0xff] %vm40_vm0, %v413_v1  ;;  %v374_v5 = vmul.f32 0.6931472, %v570_v27  ;;  %579 = vlog2.f32 %v316_v23 }
 0x168   :  { %v414_v33 = vsub.f32 %v920_v37, %v372_v34  ;;  %581 = vlog2.f32 %v319_v2 }
 0x169   :  { %v572_v36 = vpop.eup %571  ;;  %v415_v30 = vsub.f32 %v927_v40, %v374_v5 }
 0x16a   :  { %v574_v31 = vpop.eup %573  ;;  %446 = vst.msk [vmem:[%s1144_s1 + $0xa8] sm:$0xff] %vm40_vm0, %v414_v33  ;;  %v376_v8 = vmul.f32 0.6931472, %v572_v36  ;;  %v322_v35 = vpop.xlane.xlu1 %321 }
 0x16b   :  { %v325_v47 = vpop.xlane.xlu0 %324  ;;  %447 = vst.msk [vmem:[%s1144_s1 + $0xb0] sm:$0xff] %vm40_vm0, %v415_v30  ;;  %v378_v38 = vmul.f32 0.6931472, %v574_v31  ;;  %583 = vlog2.f32 %v322_v35 }
 0x16c   :  { %v416_v37 = vsub.f32 %v930_v41, %v376_v8  ;;  %585 = vlog2.f32 %v325_v47 }
 0x16d   :  { %v576_v40 = vpop.eup %575  ;;  %v417_v9 = vsub.f32 %v937_v44, %v378_v38 }
 0x16e   :  { %v578_v39 = vpop.eup %577  ;;  %448 = vst.msk [vmem:[%s1144_s1 + $0xb8] sm:$0xff] %vm40_vm0, %v416_v37  ;;  %v380_v42 = vmul.f32 0.6931472, %v576_v40  ;;  %v328_v43 = vpop.xlane.xlu1 %327 }
 0x16f   :  { %449 = vst.msk [vmem:[%s1144_s1 + $0xc0] sm:$0xff] %vm40_vm0, %v417_v9  ;;  %v382_v46 = vmul.f32 0.6931472, %v578_v39  ;;  %587 = vlog2.f32 %v328_v43 }
 0x170   :  { %v418_v41 = vsub.f32 %v940_v45, %v380_v42 }
 0x171   :  { %v580_v12 = vpop.eup %579  ;;  %v419_v44 = vsub.f32 %v947_v48, %v382_v46 }
 0x172   :  { %v582_v16 = vpop.eup %581  ;;  %450 = vst.msk [vmem:[%s1144_s1 + $0xc8] sm:$0xff] %vm40_vm0, %v418_v41  ;;  %v384_v13 = vmul.f32 0.6931472, %v580_v12 }
 0x173   :  { %451 = vst.msk [vmem:[%s1144_s1 + $0xd0] sm:$0xff] %vm40_vm0, %v419_v44  ;;  %v386_v50 = vmul.f32 0.6931472, %v582_v16 }
 0x174   :  { %v420_v51 = vsub.f32 %v950_v49, %v384_v13 }
 0x175   :  { %v584_v54 = vpop.eup %583  ;;  %v421_v45 = vsub.f32 %v957_v52, %v386_v50 }
 0x176   :  { %v586_v6 = vpop.eup %585  ;;  %452 = vst.msk [vmem:[%s1144_s1 + $0xd8] sm:$0xff] %vm40_vm0, %v420_v51  ;;  %v388_v48 = vmul.f32 0.6931472, %v584_v54 }
 0x177   :  { %453 = vst.msk [vmem:[%s1144_s1 + $0xe0] sm:$0xff] %vm40_vm0, %v421_v45  ;;  %v390_v60 = vmul.f32 0.6931472, %v586_v6 }
 0x178   :  { %v422_v17 = vsub.f32 %v960_v53, %v388_v48 }
 0x179   :  { %v588_v20 = vpop.eup %587  ;;  %v423_v49 = vsub.f32 %v967_v56, %v390_v60 }
 0x17a   :  { %454 = vst.msk [vmem:[%s1144_s1 + $0xe8] sm:$0xff] %vm40_vm0, %v422_v17  ;;  %v392_v52 = vmul.f32 0.6931472, %v588_v20 }
 0x17b   :  { %455 = vst.msk [vmem:[%s1144_s1 + $0xf0] sm:$0xff] %vm40_vm0, %v423_v49 }
 0x17c   :  { %v424_v55 = vsub.f32 %v970_v57, %v392_v52 }
 0x17e   :  { %456 = vst.msk [vmem:[%s1144_s1 + $0xf8] sm:$0xff] %vm40_vm0, %v424_v55 }

// kernel: _device_forward.3
= control target key start
LH: loop header
LB: loop body
LE: loop exit
PB: predicated region body
PF: predicated region fallthrough
CT: control target
= control target key end

     0   :  { %7 = vsyncpa [#allocation3], 0  ;;  %s900_s0 = inlined_call_operand.vmem [shape: f32[2,8,24], index: 0, kind: input, shape index: {}]   ;;  %s901_s1 = inlined_call_operand.vmem [shape: f32[2,16,128], index: 1, kind: input, shape index: {}]   ;;  %s902_s2 = inlined_call_operand.hbm [shape: f32[2,8,128], index: 2, kind: output, shape index: {}]  }
   0x1   :  { %9 = vsyncpa [#allocation3 + $0x1], 0  ;;  %s745_s9 = smov 0   ;;  %s747_s10 = smov 0  }
   0x2   :  { %s749_s11 = smov 0   ;;  %s751_s12 = smov 0  }
   0x3   :  { %s753_s13 = smov 0   ;;  %s755_s14 = smov 0  }
   0x4 LB: > { %s525_s15 = sadd.s32 4294967295, %s711_s14   ;;  %s526_s16 = sadd.s32 4294967294, %s711_s14   ;;  %s711_s14 = sphi %s755_s14, %s15_s14   ;;  %s707_s13 = sphi %s753_s13, %s909_s13   ;;  %s703_s12 = sphi %s751_s12, %s908_s12   ;;  %s699_s11 = sphi %s749_s11, %s907_s11   ;;  %s695_s10 = sphi %s747_s10, %s906_s10   ;;  %s691_s9 = sphi %s745_s9, %s905_s9  }
   0x5   : > { %s34_s17 = sadd.s32 1, %s707_s13  ;;  %s101_s18 = sadd.s32 1, %s699_s11 }
   0x6   : > { %p36_p0 = scmp.ge.s32.totalorder %s34_s17, 2  ;;  %p111_p1 = scmp.ne.s32.totalorder %s699_s11, %s695_s10 }
   0x7   : > { %p112_p2 = scmp.eq.s32.totalorder %s525_s15, 1  ;;  %p117_p3 = scmp.ne.s32.totalorder %s695_s10, %s691_s9 }
   0x8   : > { %s911_s17 = smov (%p36_p0, %s34_s17), 0  ;;  %p118_p5 = scmp.eq.s32.totalorder %s526_s16, 1 }
   0x9   : > { %p785_p4 = por %p112_p2, %p111_p1  ;;  %s94_s20 = ssub.s32 %s707_s13, %s911_s17 }
   0xa   : > { %p529_p6 = scmp.ge.s32.totalorder %s711_s14, 1  ;;  %p99_p7 = scmp.eq.s32.totalorder %s94_s20, 0 }
   0xb   : > { %p792_p8 = por %p118_p5, %p117_p3  ;;  %p157_p9 = scmp.lt.s32.totalorder %s711_s14, 3 }
   0xc   : > { %s798_s22 = scalar_select %p99_p7, %s699_s11, %s101_s18  }
   0xd   : > { %p158_p10 = pnand %p529_p6, %p157_p9 }
   0xe   : > { %p189_p11 = scmp.lt.s32.totalorder (!%p158_p10), %s703_s12, 1  ;;  %v713_v0 = vmov (!%p158_p10), 10   ;;  %v714_v1 = vmov (!%p158_p10), 8   ;;  %v715_v5 = vmov (!%p158_p10), 11   ;;  %v716_v6 = vmov (!%p158_p10), 9   ;;  %s186_s4 = sand.u32 (!%p158_p10), 1, %s695_s10  }
   0xf   : > { %161 = sbr.rel (%p158_p10) target bundleno = 238 (0xee), region = 28  ;;  %612 = vset.pattern.permute.xlu1 (!%p158_p10), %v713_v0  ;;  %610 = vset.pattern.permute.xlu0 (!%p158_p10), %v714_v1  ;;  %v717_v8 = vmov (!%p158_p10), 12   ;;  %v718_v9 = vmov (!%p158_p10), 13   ;;  %v719_v10 = vmov (!%p158_p10), 14   ;;  %v720_v11 = vmov (!%p158_p10), 16   ;;  %s530_s5 = sshll.u32 (!%p158_p10), %s186_s4, 3 }
  0x10   : > { %v721_v14 = vmov (!%p158_p10), 15   ;;  %v722_v15 = vmov (!%p158_p10), 19   ;;  %v723_v16 = vmov (!%p158_p10), 17   ;;  %v724_v17 = vmov (!%p158_p10), 23   ;;  %s535_s6 = sshll.u32 (!%p158_p10), %s703_s12, 7  ;;  %s188_s7 = scalar_lea.vmem (!%p158_p10), [#allocation2], %s530_s5 }
  0x11   : > { %v725_v21 = vmov (!%p158_p10), 18   ;;  %v726_v29 = vmov (!%p158_p10), 20   ;;  %v727_v35 = vmov (!%p158_p10), 21   ;;  %v728_v38 = vmov (!%p158_p10), 22   ;;  %s432_s8 = sshll.u32 (!%p158_p10), %s188_s7, 4  ;;  %s853_s18 = scalar_lea.hbm (!%p158_p10), %s902_s2, %s535_s6  ;;  %s855_s8 = int_to_ptr.vmem [resolvable:$true] %s432_s8 }
  0x12   : > { %vm229_vm1 = vcmask (!%p158_p10), 64512   ;;  %v242_v41 = vlaneseq (!%p158_p10)  ;;  %s417_s20 = scalar_lea.sflag (!%p158_p10), [#allocation3], %s186_s4 }
  0x14   : > { %v831_v43 = vshrl.u32 (!%p158_p10), %v242_v41, 7 }
  0x16   : > { %s802_s23 = scalar_select %p189_p11, %s703_s12, 1  ;;  %v255_v45 = vsub.s32 1, %v831_v43  ;;  %v244_v47 = vsub.s32 0, %v831_v43  ;;  %v266_v49 = vsub.s32 2, %v831_v43  ;;  %v277_v56 = vsub.s32 3, %v831_v43 }
  0x17   : > { %v288_v62 = vsub.s32 4, %v831_v43  ;;  %s729_s12 = smov [#allocation2]  }
  0x18   : > { %s531_s24 = sshll.u32 %s802_s23, 3  ;;  %s538_s28 = sshll.u32 %s802_s23, 4 }
  0x19   : > { %s195_s27 = scalar_lea.vmem %s900_s0, %s531_s24  ;;  %s836_s3 = scalar_lea.vmem %s901_s1, %s538_s28 }
  0x1a   : > { %v808_v2 = vld [vmem:[%s195_s27] sm:$0xff]  ;;  %s633_s23 = scalar_lea.vmem %s855_s8, 128  ;;  %s637_s24 = sshll.u32 %s729_s12, 4  ;;  %s638_s24 = int_to_ptr.vmem [resolvable:$false] %s637_s24 }
  0x1b   : > { %261 = vperm.xlu1 %612, %v808_v2   ;;  %239 = vperm.xlu0 %610, %v808_v2   ;;  %v205_v3 = vand.u32 2147483647, %v808_v2  ;;  %vm217_vm0 = vcmp.ge.f32.partialorder %v808_v2, 0.0  ;;  %v214_v18 = vsub.f32 0.0, %v808_v2  ;;  %v212_v25 = vmax.f32 %v808_v2, 0.0  ;;  %v235_v48 = vld [vmem:[%s836_s3] sm:$0xff]  ;;  %p634_p12 = scmp.ne.s32.totalorder %s855_s8, %s633_s23  ;;  %p640_p1 = scmp.lt.s32.totalorder %s855_s8, %s638_s24 }
  0x1c   : > { %v256_v50 = vrot.slane %v235_v48, %v255_v45  ;;  %v245_v52 = vrot.slane %v235_v48, %v244_v47  ;;  %v267_v54 = vrot.slane %v235_v48, %v266_v49  ;;  %v278_v61 = vrot.slane %v235_v48, %v277_v56  ;;  %s639_s25 = scalar_lea.vmem %s638_s24, 256 }
  0x1d   : > { %v206_v4 = vsub.f32 0.0, %v205_v3  ;;  %v215_v26 = vmax.f32 %v214_v18, 0.0  ;;  %v289_v3 = vrot.slane %v235_v48, %v288_v62  ;;  %p635_p13 = pnand %p634_p12, %p785_p4  ;;  %p641_p2 = scmp.lt.s32.totalorder %s639_s25, %s633_s23 }
  0x1f   : > { %613 = vset.pattern.permute.xlu1 %v715_v5  ;;  %611 = vset.pattern.permute.xlu0 %v716_v6  ;;  %v207_v7 = vmul.f32 1.442695, %v206_v4  ;;  %v299_v5 = vsub.s32 5, %v831_v43  ;;  %p636_p0 = pneg %p635_p13  ;;  %p642_p3 = por %p641_p2, %p640_p1 }
  0x20   : > { %272 = vperm.xlu1 %613, %v808_v2   ;;  %250 = vperm.xlu0 %611, %v808_v2  }
  0x21   : > { %627 = vpow2.f32 %v207_v7  ;;  %p643_p5 = pnand %p642_p3, %p636_p0 }
  0x24   : > { %614 = vset.pattern.permute.xlu1 %v717_v8  ;;  %615 = vset.pattern.permute.xlu0 %v718_v9  ;;  %v310_v9 = vsub.s32 6, %v831_v43 }
  0x25   : > { %283 = vperm.xlu1 %614, %v808_v2   ;;  %294 = vperm.xlu0 %615, %v808_v2  }
  0x29   : > { %616 = vset.pattern.permute.xlu1 %v719_v10  ;;  %618 = vset.pattern.permute.xlu0 %v720_v11  ;;  %v300_v11 = vrot.slane %v235_v48, %v299_v5 }
  0x2a   : > { %305 = vperm.xlu1 %616, %v808_v2   ;;  %327 = vperm.xlu0 %618, %v808_v2  }
  0x2b   : > { %v628_v12 = vpop.eup %627 }
  0x2c   : > { %v209_v13 = vadd.f32 1.0, %v628_v12  ;;  %v218_v19 = vsel %vm217_vm0, 1.0, %v628_v12  ;;  %v321_v12 = vsub.s32 7, %v831_v43 }
  0x2e   : > { %617 = vset.pattern.permute.xlu1 %v721_v14  ;;  %621 = vset.pattern.permute.xlu0 %v722_v15  ;;  %629 = vlog2.f32 %v209_v13  ;;  %v322_v18 = vrot.slane %v235_v48, %v321_v12 }
  0x2f   : > { %316 = vperm.xlu1 %617, %v808_v2   ;;  %360 = vperm.xlu0 %621, %v808_v2   ;;  %631 = vrcp.f32 %v209_v13 }
  0x33   : > { %619 = vset.pattern.permute.xlu1 %v723_v16  ;;  %626 = vset.pattern.permute.xlu0 %v724_v17  ;;  %v311_v16 = vrot.slane %v235_v48, %v310_v9 }
  0x34   : > { %338 = vperm.xlu1 %619, %v808_v2  }
  0x38   : > { %v630_v20 = vpop.eup %629  ;;  %620 = vset.pattern.permute.xlu1 %v725_v21 }
  0x39   : > { %v632_v22 = vpop.eup %631  ;;  %349 = vperm.xlu1 %620, %v808_v2   ;;  %v211_v24 = vmul.f32 0.6931472, %v630_v20 }
  0x3a   : > { %v220_v23 = vmul.f32 %v632_v22, %v218_v19  ;;  %v236_v22 = vld [vmem:[%s836_s3 + $0x8] sm:$0xff] }
  0x3b   : > { %v213_v31 = vadd.f32 %v212_v25, %v211_v24  ;;  %v216_v32 = vadd.f32 %v215_v26, %v211_v24 }
  0x3c   : > { %v221_v27 = vmul.f32 %v220_v23, %v220_v23  ;;  %v224_v28 = vsub.f32 1.0, %v220_v23 }
  0x3d   : > { %622 = vset.pattern.permute.xlu1 %v726_v29 }
  0x3e   : > { %371 = vperm.xlu1 %622, %v808_v2   ;;  %v225_v30 = vmul.f32 %v224_v28, %v224_v28  ;;  %v222_v33 = vmul.f32 0.75, %v221_v27  ;;  %v333_v27 = vrot.slane %v236_v22, %v244_v47 }
  0x40   : > { %v226_v34 = vmul.f32 0.25, %v225_v30  ;;  %v223_v36 = vmul.f32 %v222_v33, %v213_v31  ;;  %v344_v31 = vrot.slane %v236_v22, %v255_v45 }
  0x42   : > { %623 = vset.pattern.permute.xlu1 %v727_v35  ;;  %v227_v37 = vmul.f32 %v226_v34, %v216_v32  ;;  %v355_v34 = vrot.slane %v236_v22, %v266_v49 }
  0x43   : > { %382 = vperm.xlu1 %623, %v808_v2  }
  0x44   : > { %v228_v39 = vsub.f32 %v227_v37, %v223_v36 }
  0x46   : > { %v230_v40 = vsel %vm229_vm1, %v228_v39, 0.0 }
  0x47   : > { %624 = vset.pattern.permute.xlu1 %v728_v38 }
  0x48   : > { %393 = vperm.xlu1 %624, %v808_v2  }
  0x4c   : > { %625 = vset.pattern.permute.xlu1 %v724_v17 }
  0x4d   : > { %404 = vperm.xlu1 %625, %v808_v2  }
  0x4e   : > { %231 = vadd.xlane.f32.xlu0 %v230_v40  ;;  %v366_v40 = vrot.slane %v236_v22, %v277_v56 }
  0x9a   : > { %v262_v42 = vpop.permute.xlu1 %261  ;;  %v240_v44 = vpop.permute.xlu0 %239 }
  0x9b   : > { %v246_v57 = vsub.f32 %v240_v44, %v245_v52  ;;  %v268_v59 = vsub.f32 %v262_v42, %v267_v54 }
  0x9d   : > { %v247_v63 = vand.u32 2147483647, %v246_v57  ;;  %v269_v0 = vand.u32 2147483647, %v268_v59 }
  0x9f   : > { %v273_v46 = vpop.permute.xlu1 %272  ;;  %v251_v51 = vpop.permute.xlu0 %250 }
  0xa0   : > { %v257_v55 = vsub.f32 %v251_v51, %v256_v50  ;;  %v279_v2 = vsub.f32 %v273_v46, %v278_v61  ;;  %v377_v46 = vrot.slane %v236_v22, %v288_v62  ;;  %v388_v51 = vrot.slane %v236_v22, %v299_v5 }
  0xa2   : > { %v258_v60 = vand.u32 2147483647, %v257_v55  ;;  %v280_v7 = vand.u32 2147483647, %v279_v2  ;;  %v410_v55 = vrot.slane %v236_v22, %v321_v12 }
  0xa4   : > { %v284_v53 = vpop.permute.xlu1 %283  ;;  %v259_v1 = vadd.f32 %v258_v60, %v247_v63  ;;  %v295_v13 = vpop.permute.xlu0 %294 }
  0xa5   : > { %v290_v8 = vsub.f32 %v284_v53, %v289_v3  ;;  %v301_v17 = vsub.f32 %v295_v13, %v300_v11  ;;  %v399_v53 = vrot.slane %v236_v22, %v310_v9 }
  0xa6   : > { %v270_v6 = vadd.f32 %v269_v0, %v259_v1 }
  0xa7   : > { %v291_v15 = vand.u32 2147483647, %v290_v8  ;;  %v302_v23 = vand.u32 2147483647, %v301_v17 }
  0xa8   : > { %v281_v14 = vadd.f32 %v280_v7, %v270_v6 }
  0xa9   : > { %v306_v58 = vpop.permute.xlu1 %305  ;;  %v328_v28 = vpop.permute.xlu0 %327 }
  0xaa   : > { %v292_v20 = vadd.f32 %v291_v15, %v281_v14  ;;  %v312_v21 = vsub.f32 %v306_v58, %v311_v16  ;;  %v334_v33 = vsub.f32 %v328_v28, %v333_v27 }
  0xac   : > { %v303_v25 = vadd.f32 %v302_v23, %v292_v20  ;;  %v313_v26 = vand.u32 2147483647, %v312_v21  ;;  %v335_v38 = vand.u32 2147483647, %v334_v33 }
  0xae   : > { %v317_v4 = vpop.permute.xlu1 %316  ;;  %v314_v32 = vadd.f32 %v313_v26, %v303_v25  ;;  %v361_v43 = vpop.permute.xlu0 %360 }
  0xaf   : > { %v323_v24 = vsub.f32 %v317_v4, %v322_v18  ;;  %v367_v48 = vsub.f32 %v361_v43, %v366_v40 }
  0xb1   : > { %v324_v30 = vand.u32 2147483647, %v323_v24  ;;  %v368_v49 = vand.u32 2147483647, %v367_v48 }
  0xb3   : > { %v339_v10 = vpop.permute.xlu1 %338  ;;  %v325_v35 = vadd.f32 %v324_v30, %v314_v32 }
  0xb4   : > { %v345_v36 = vsub.f32 %v339_v10, %v344_v31 }
  0xb5   : > { %v336_v41 = vadd.f32 %v335_v38, %v325_v35 }
  0xb6   : > { %v346_v42 = vand.u32 2147483647, %v345_v36 }
  0xb8   : > { %v350_v19 = vpop.permute.xlu1 %349  ;;  %v347_v50 = vadd.f32 %v346_v42, %v336_v41 }
  0xb9   : > { %v356_v39 = vsub.f32 %v350_v19, %v355_v34 }
  0xbb   : > { %v357_v44 = vand.u32 2147483647, %v356_v39 }
  0xbd   : > { %v372_v29 = vpop.permute.xlu1 %371  ;;  %v358_v45 = vadd.f32 %v357_v44, %v347_v50 }
  0xbe   : > { %v378_v52 = vsub.f32 %v372_v29, %v377_v46 }
  0xbf   : > { %v369_v58 = vadd.f32 %v368_v49, %v358_v45 }
  0xc0   : > { %v379_v56 = vand.u32 2147483647, %v378_v52 }
  0xc2   : > { %v383_v37 = vpop.permute.xlu1 %382  ;;  %v380_v62 = vadd.f32 %v379_v56, %v369_v58 }
  0xc3   : > { %v389_v54 = vsub.f32 %v383_v37, %v388_v51 }
  0xc5   : > { %v390_v60 = vand.u32 2147483647, %v389_v54 }
  0xc7   : > { %v394_v47 = vpop.permute.xlu1 %393  ;;  %v391_v0 = vadd.f32 %v390_v60, %v380_v62 }
  0xc8   : > { %v400_v59 = vsub.f32 %v394_v47, %v399_v53 }
  0xca   : > { %v401_v63 = vand.u32 2147483647, %v400_v59 }
  0xcc   : > { %v405_v57 = vpop.permute.xlu1 %404  ;;  %v402_v2 = vadd.f32 %v401_v63, %v391_v0 }
  0xcd   : > { %v411_v61 = vsub.f32 %v405_v57, %v410_v55 }
  0xcf   : > { %v412_v1 = vand.u32 2147483647, %v411_v61 }
  0xd1   : > { %v413_v4 = vadd.f32 %v412_v1, %v402_v2 }
  0xdb   : > { %v232_v3 = vpop.xlane.xlu0 %231 }
  0xdc   : > { %v234_v5 = vmul.f32 0.125, %v232_v3 }
  0xde   : > { %v414_v6 = vadd.f32 %v413_v4, %v234_v5 }
  0xe0   : > { %415 = vst [vmem:[%s188_s7] sm:$0xff] %v414_v6 }
  0xe1   : > { %646 = shalt.err (!%p643_p5)
}
  0xe2   : > { %s647_s26 = scalar_lea.hbm %s853_s18, 128  ;;  %s651_s29 = scalar_lea.hbm %s902_s2, 256 }
  0xe3   : > { %p648_p6 = scmp.ne.s32.totalorder %s853_s18, %s647_s26  ;;  %p652_p10 = scmp.lt.u32.totalorder %s853_s18, %s902_s2 }
  0xe4   : > { %p653_p11 = scmp.lt.u32.totalorder %s651_s29, %s647_s26  ;;  %p655_p13 = scmp.lt.u32.totalorder %s647_s26, %s853_s18 }
  0xe5   : > { %p649_p7 = pnand %p648_p6, %p785_p4 }
  0xe6   : > { %p654_p12 = por %p653_p11, %p652_p10 }
  0xe7   : > { %p650_p9 = pneg %p649_p7 }
  0xe8   : > { %p656_p0 = por %p655_p13, %p654_p12 }
  0xea   : > { %p657_p1 = pnand %p656_p0, %p650_p9 }
  0xec   : > { %660 = shalt.err (!%p657_p1)
}
  0xed   : > { %539 = dma.vmem_to_hbm [thread:$0]  (%p785_p4), %s855_s8, 128, %s853_s18, %s417_s20  }
  0xee PF: > { %p545_p2 = scmp.ge.s32.totalorder %s711_s14, 2  ;;  %s444_s4 = sand.u32 1, %s691_s9  }
  0xef   : > { %s445_s5 = scalar_lea.sflag [#allocation3], %s444_s4 }
  0xf0   : > { %p542_p3 = pnand %p545_p2, %p792_p8 }
  0xf2   : > { %686 = dma.done.wait (!%p542_p3), %s445_s5, 128  }
  0xf3   : > { %688 = vsyncadd (!%p542_p3), %s445_s5, 4294967168  ;;  %s15_s14 = sadd.s32 1, %s711_s14   ;;  %s905_s9 = smov %s695_s10 }
  0xf4   : > { %p12_p5 = scmp.ge.s32.totalorder %s15_s14, 4   ;;  %s906_s10 = smov %s699_s11 }
  0xf5   : > { %s907_s11 = smov %s798_s22  ;;  %s908_s12 = smov %s707_s13 }
  0xf6   : > { %s909_s13 = smov %s911_s17  ;;  %14 = sbr.rel (!%p12_p5) target bundleno = 4 (0x4), region = 66 }
  0xfd   :  { %450 = vsyncpa [#allocation3], 1 }
  0xfe   :  { %452 = vsyncpa [#allocation3 + $0x1], 1 }

</bundles_post_ra>
